<compile_context>
chip_gen: v5e
topology: v5e:2x2
jax: 0.10.0
libtpu: 0.0.40
codegen_flags: <defaults>
</compile_context>

<pallas_src>
import functools

import jax
import jax.numpy as jnp
from jax.experimental import pallas as pl
from jax.experimental.pallas import tpu as pltpu


def _rec_softmax_actor_kernel(
    x_ref,          # (T*Bp, O)   time-major, batch-padded, flat obs
    h0_ref,         # (Bp, H)     initial GRU hidden state
    w1_ref,         # (O, H)      hidden_1 weight
    wih_ref,        # (H, Gp)     GRU W_ih, gates r|z|n packed + zero lanes
    whh_ref,        # (H, Gp)     GRU W_hh, gates r|z|n packed + zero lanes
    w2_ref,         # (H, H)      hidden_2 weight
    wout_ref,       # (H, Ap)     output head weight, lane-padded
    bias_ref,       # (8, Wp)     packed bias rows:
                    #   row 0: b1            (H lanes)
                    #   row 1: bi_r|bi_z|bi_n (Gp lanes; r/z have b_hh folded)
                    #   row 2: 0|0|b_hn      (Gp lanes; r-gated hidden bias)
                    #   row 3: b2            (H lanes)
                    #   row 4: bout (+ -1e30 pad lanes) (Ap lanes)
    probs_ref,      # (T*Bp, Ap)  out: softmax probs (lane-dense)
    hout_ref,       # (Bp, H)     out: final GRU hidden state
    gi_s,           # VMEM (T*Bp, Gp)  packed precomputed input gates
    h_all_s,        # VMEM (T*Bp, H)   per-step hidden states
    *, t_steps, b_pad, h_size, g_pad, a_pad,
):
    H = h_size

    b1 = bias_ref[0:1, :H]
    bi = bias_ref[1:2, :g_pad]
    b2 = bias_ref[3:4, :H]
    bout = bias_ref[4:5, :a_pad]

    # ---------- Phase 1 (batched, off the recurrent critical path) ----------
    # hidden_1 + tanh for all timesteps, then ONE fused input-gate projection
    # (r|z|n packed, biases for r/z folded) written to a lane-dense scratch.
    x1 = jnp.tanh(
        jnp.dot(x_ref[...], w1_ref[...], preferred_element_type=jnp.float32) + b1
    )
    gi_s[...] = (
        jnp.dot(x1, wih_ref[...], preferred_element_type=jnp.float32) + bi
    )

    # Hoisted weight load / bias broadcast (JAX does not CSE broadcast_in_dim
    # and the loop below may be fully unrolled).
    whh = whh_ref[...]
    bh = jnp.broadcast_to(bias_ref[2:3, :g_pad], (b_pad, g_pad))

    # ---------- Phase 2: the irreducible GRU recurrence ----------
    # One MXU matmul + one sigmoid + one tanh per step; nothing else sits on
    # the h dependency chain.
    def step(t, h_prev):
        row = pl.multiple_of(t * b_pad, b_pad)          # sublane-aligned offset
        sl = pl.ds(row, b_pad)
        gh = jnp.dot(h_prev, whh, preferred_element_type=jnp.float32) + bh
        gi = gi_s[sl, :]
        rz = jax.nn.sigmoid(gi[:, : 2 * H] + gh[:, : 2 * H])
        r = rz[:, :H]
        z = rz[:, H: 2 * H]
        n = jnp.tanh(gi[:, 2 * H: 3 * H] + r * gh[:, 2 * H: 3 * H])
        h_new = n + z * (h_prev - n)                    # == (1 - z) * n + z * h_prev
        h_all_s[sl, :] = h_new
        return h_new

    unroll = True if t_steps <= 16 else 8               # partial unroll for long T
    h_final = jax.lax.fori_loop(0, t_steps, step, h0_ref[...], unroll=unroll)
    hout_ref[...] = h_final

    # ---------- Phase 3 (batched): hidden_2 + output head + softmax ----------
    h_all = h_all_s[...]
    y = jnp.tanh(
        jnp.dot(h_all, w2_ref[...], preferred_element_type=jnp.float32) + b2
    )
    logits = jnp.dot(y, wout_ref[...], preferred_element_type=jnp.float32) + bout
    m = jnp.max(logits, axis=-1, keepdims=True)
    e = jnp.exp(logits - m)                             # -1e30 padded cols -> exactly 0
    denom = jnp.sum(e, axis=-1, keepdims=True)
    # Exact divide: rows must sum to 1 (probs feed a categorical sampler /
    # log-prob / entropy downstream).  One lane-dense (T*Bp, Ap) store.
    probs_ref[...] = e / denom


def rec_softmax_actor_forward(x, h, params):
    """x: (B, T, o_size) float32;  h: (1, B, h_size) float32 -> (probs, h_out)."""
    B, T, O = x.shape
    H = h.shape[-1]
    A = params["wout"].shape[-1]

    B_pad = ((B + 7) // 8) * 8              # pad batch to the 8-sublane tile
    A_pad = ((A + 127) // 128) * 128        # lane-dense output width
    G_pad = ((3 * H + 127) // 128) * 128    # lane-dense packed-gate width
    W_pad = max(G_pad, A_pad, ((H + 127) // 128) * 128)  # packed-bias tile width

    # Layout plumbing on the XLA side (free): time-major, batch-padded,
    # flattened to 2-D so the kernel never reshapes across (8,128) tiles.
    x_tm = jnp.transpose(x, (1, 0, 2))                        # (T, B, O)
    x_tm = jnp.pad(x_tm, ((0, 0), (0, B_pad - B), (0, 0)))
    x_flat = x_tm.reshape(T * B_pad, O)
    h0 = jnp.pad(h[0], ((0, B_pad - B), (0, 0)))              # (B_pad, H)

    # GRU gate packing (PyTorch order r, z, n).  b_ih + b_hh fold into the
    # precomputed input term for r/z; b_hh_n is multiplied by r, so it rides
    # with the per-step hidden projection.  Weights/biases are padded with
    # zero lanes to a lane-dense (., G_pad) layout.
    wih, whh = params["wih"], params["whh"]
    bih, bhh = params["bih"], params["bhh"]
    wih_rzn = jnp.pad(wih, ((0, 0), (0, G_pad - 3 * H)))      # (H, G_pad)
    whh_rzn = jnp.pad(whh, ((0, 0), (0, G_pad - 3 * H)))      # (H, G_pad)
    bi_rzn = jnp.concatenate(
        [bih[:, : 2 * H] + bhh[:, : 2 * H], bih[:, 2 * H:]], axis=1)
    bh_rzn = jnp.concatenate(
        [jnp.zeros((1, 2 * H), jnp.float32), bhh[:, 2 * H:]], axis=1)

    # Pad the output head to a lane-dense width; padded logits get a huge
    # negative bias so exp() underflows to 0 and the softmax is unchanged.
    wout_p = jnp.pad(params["wout"], ((0, 0), (0, A_pad - A)))
    bout_p = jnp.pad(params["bout"], ((0, 0), (0, A_pad - A)),
                     constant_values=-1e30)

    # Pack all bias rows into a single (8, W_pad) tile -> one prologue DMA.
    def _row(v):
        return jnp.pad(v, ((0, 0), (0, W_pad - v.shape[1])))
    bias_pack = jnp.concatenate(
        [_row(params["b1"]), _row(bi_rzn), _row(bh_rzn), _row(params["b2"]),
         _row(bout_p), jnp.zeros((3, W_pad), jnp.float32)], axis=0)

    # NOTE: per-step MXU cost is nearly flat in batch up to ~128, so if many
    # environments exist they should be batched into one call (B_pad up to
    # 128).  On v7x, once batch >= 16, add a leading grid axis over batch
    # groups with dimension_semantics=("parallel",) to engage the 2nd
    # TensorCore.  For very long rollouts (T in the thousands) tile Phases
    # 1/3 over a T grid instead of holding all T resident in VMEM.
    kernel = functools.partial(
        _rec_softmax_actor_kernel,
        t_steps=T, b_pad=B_pad, h_size=H, g_pad=G_pad, a_pad=A_pad)
    vmem = pl.BlockSpec(memory_space=pltpu.MemorySpace.VMEM)
    probs_flat, h_out_pad = pl.pallas_call(
        kernel,
        out_shape=(
            jax.ShapeDtypeStruct((T * B_pad, A_pad), jnp.float32),
            jax.ShapeDtypeStruct((B_pad, H), jnp.float32),
        ),
        in_specs=[vmem] * 8,
        out_specs=(vmem, vmem),
        scratch_shapes=[
            pltpu.VMEM((T * B_pad, G_pad), jnp.float32),   # packed gi
            pltpu.VMEM((T * B_pad, H), jnp.float32),       # per-step h
        ],
        compiler_params=pltpu.CompilerParams(
            vmem_limit_bytes=32 * 1024 * 1024),
    )(
        x_flat, h0,
        params["w1"], wih_rzn, whh_rzn, params["w2"], wout_p, bias_pack,
    )

    probs = probs_flat.reshape(T, B_pad, A_pad)[:, :B, :A]
    probs = jnp.transpose(probs, (1, 0, 2))                   # (B, T, A)
    h_out = h_out_pad[:B][None]                               # (1, B, H)
    return probs, h_out


def _reference_forward(x, h, p):
    """Pure-JAX reference of the same forward, for correctness checking."""
    H = h.shape[-1]
    x1 = jnp.tanh(x @ p["w1"] + p["b1"])                 # (B, T, H)
    T = x1.shape[1]
    h_t = h[0]
    ys = []
    for t in range(T):
        gi = x1[:, t, :] @ p["wih"] + p["bih"]
        gh = h_t @ p["whh"] + p["bhh"]
        r = jax.nn.sigmoid(gi[:, :H] + gh[:, :H])
        z = jax.nn.sigmoid(gi[:, H:2 * H] + gh[:, H:2 * H])
        n = jnp.tanh(gi[:, 2 * H:] + r * gh[:, 2 * H:])
        h_t = (1.0 - z) * n + z * h_t
        ys.append(h_t)
    y = jnp.stack(ys, axis=1)                            # (B, T, H)
    y = jnp.tanh(y @ p["w2"] + p["b2"])
    logits = y @ p["wout"] + p["bout"]
    return jax.nn.softmax(logits, axis=-1), h_t[None]


def init_params(key, o_size, h_size, a_size):
    ks = jax.random.split(key, 5)
    gain_tanh = 5.0 / 3.0

    def xavier(k, shape, gain=1.0):
        fan_in, fan_out = shape
        lim = gain * (6.0 / (fan_in + fan_out)) ** 0.5
        return jax.random.uniform(k, shape, jnp.float32, -lim, lim)

    return {
        # Linear(o_size, h_size, act_fn='tanh'), bias = 0 (weights stored (in, out))
        "w1": xavier(ks[0], (o_size, h_size), gain_tanh),
        "b1": jnp.zeros((1, h_size), jnp.float32),
        # GRU(h_size, h_size): weight_ih / weight_hh, gate order [r, z, n]
        "wih": xavier(ks[1], (h_size, 3 * h_size)),
        "bih": jnp.zeros((1, 3 * h_size), jnp.float32),
        "whh": xavier(ks[2], (h_size, 3 * h_size)),
        "bhh": jnp.zeros((1, 3 * h_size), jnp.float32),
        # Linear(h_size, h_size, act_fn='tanh'), bias = 0
        "w2": xavier(ks[3], (h_size, h_size), gain_tanh),
        "b2": jnp.zeros((1, h_size), jnp.float32),
        # output head: nn.Linear(h_size, a_size)
        "wout": xavier(ks[4], (h_size, a_size)),
        "bout": jnp.zeros((1, a_size), jnp.float32),
    }


if __name__ == "__main__":
    B, T = 2, 8
    O_SIZE, H_SIZE = 16, 32
    A_SIZE = 7  # len(ACTIONS)

    key = jax.random.PRNGKey(0)
    kp, kx, kh = jax.random.split(key, 3)
    params = init_params(kp, O_SIZE, H_SIZE, A_SIZE)

    x = jax.random.normal(kx, (B, T, O_SIZE), jnp.float32)
    h0 = jax.random.normal(kh, (1, B, H_SIZE), jnp.float32) * 0.1

    probs, h_out = rec_softmax_actor_forward(x, h0, params)
    probs = jax.block_until_ready(probs)
    h_out = jax.block_until_ready(h_out)

    # sanity: shapes, rows sum to 1 (exact divide), matches JAX reference
    ref_probs, ref_h = _reference_forward(x, h0, params)
    assert probs.shape == (B, T, A_SIZE) and h_out.shape == (1, B, H_SIZE)
    assert jnp.allclose(jnp.sum(probs, axis=-1), 1.0, atol=1e-3)
    assert jnp.allclose(probs, ref_probs, atol=2e-3, rtol=2e-3)
    assert jnp.allclose(h_out, ref_h, atol=1e-3, rtol=1e-3)

    print("KERNEL_OK")
</pallas_src>

<mosaic_0001>
module attributes {stable_mosaic.version = 11 : i64} {
  func.func @_rec_softmax_actor_kernel(%arg0: memref<64x16xf32, #tpu.memory_space<vmem>>, %arg1: memref<8x32xf32, #tpu.memory_space<vmem>>, %arg2: memref<16x32xf32, #tpu.memory_space<vmem>>, %arg3: memref<32x128xf32, #tpu.memory_space<vmem>>, %arg4: memref<32x128xf32, #tpu.memory_space<vmem>>, %arg5: memref<32x32xf32, #tpu.memory_space<vmem>>, %arg6: memref<32x128xf32, #tpu.memory_space<vmem>>, %arg7: memref<8x128xf32, #tpu.memory_space<vmem>>, %arg8: memref<64x128xf32, #tpu.memory_space<vmem>>, %arg9: memref<8x32xf32, #tpu.memory_space<vmem>>, %arg10: memref<64x128xf32, #tpu.memory_space<vmem>>, %arg11: memref<64x32xf32, #tpu.memory_space<vmem>>) attributes {dimension_semantics = [], scalar_prefetch = 0 : i64, scratch_operands = 2 : i64, tpu.core_type = #tpu.core_type<tc>} {
    %c0 = arith.constant 0 : index
    %c0_0 = arith.constant 0 : index
    %0 = vector.load %arg7[%c0, %c0_0] : memref<8x128xf32, #tpu.memory_space<vmem>>, vector<1x32xf32>
    %c1 = arith.constant 1 : index
    %c0_1 = arith.constant 0 : index
    %1 = vector.load %arg7[%c1, %c0_1] : memref<8x128xf32, #tpu.memory_space<vmem>>, vector<1x128xf32>
    %c3 = arith.constant 3 : index
    %c0_2 = arith.constant 0 : index
    %2 = vector.load %arg7[%c3, %c0_2] : memref<8x128xf32, #tpu.memory_space<vmem>>, vector<1x32xf32>
    %c4 = arith.constant 4 : index
    %c0_3 = arith.constant 0 : index
    %3 = vector.load %arg7[%c4, %c0_3] : memref<8x128xf32, #tpu.memory_space<vmem>>, vector<1x128xf32>
    %c0_4 = arith.constant 0 : index
    %c0_5 = arith.constant 0 : index
    %4 = vector.load %arg0[%c0_4, %c0_5] : memref<64x16xf32, #tpu.memory_space<vmem>>, vector<64x16xf32>
    %c0_6 = arith.constant 0 : index
    %c0_7 = arith.constant 0 : index
    %5 = vector.load %arg2[%c0_6, %c0_7] : memref<16x32xf32, #tpu.memory_space<vmem>>, vector<16x32xf32>
    %cst = arith.constant dense<0.000000e+00> : vector<64x32xf32>
    %6 = tpu.matmul %4, %5, %cst {dimension_numbers = #tpu.dot_dimension_numbers<[1], [0], [0], [1], [0, 0, 1, 1], [], []>} : vector<64x16xf32>, vector<16x32xf32>, vector<64x32xf32> -> vector<64x32xf32>
    %7 = vector.broadcast %0 : vector<1x32xf32> to vector<64x32xf32>
    %8 = arith.addf %6, %7 : vector<64x32xf32>
    %9 = math.tanh %8 : vector<64x32xf32>
    %c0_8 = arith.constant 0 : index
    %c0_9 = arith.constant 0 : index
    %10 = vector.load %arg3[%c0_8, %c0_9] : memref<32x128xf32, #tpu.memory_space<vmem>>, vector<32x128xf32>
    %cst_10 = arith.constant dense<0.000000e+00> : vector<64x128xf32>
    %11 = tpu.matmul %9, %10, %cst_10 {dimension_numbers = #tpu.dot_dimension_numbers<[1], [0], [0], [1], [0, 0, 1, 1], [], []>} : vector<64x32xf32>, vector<32x128xf32>, vector<64x128xf32> -> vector<64x128xf32>
    %12 = vector.broadcast %1 : vector<1x128xf32> to vector<64x128xf32>
    %13 = arith.addf %11, %12 : vector<64x128xf32>
    %c0_11 = arith.constant 0 : index
    %c0_12 = arith.constant 0 : index
    %14 = vector.load %arg10[%c0_11, %c0_12] : memref<64x128xf32, #tpu.memory_space<vmem>>, vector<64x128xf32>
    tpu.vector_store %arg10[%c0_11, %c0_12], %13 {strides = array<i32>} : memref<64x128xf32, #tpu.memory_space<vmem>>, vector<64x128xf32>,
    %c0_13 = arith.constant 0 : index
    %c0_14 = arith.constant 0 : index
    %15 = vector.load %arg4[%c0_13, %c0_14] : memref<32x128xf32, #tpu.memory_space<vmem>>, vector<32x128xf32>
    %c2 = arith.constant 2 : index
    %c0_15 = arith.constant 0 : index
    %16 = vector.load %arg7[%c2, %c0_15] : memref<8x128xf32, #tpu.memory_space<vmem>>, vector<1x128xf32>
    %17 = vector.shape_cast %16 : vector<1x128xf32> to vector<1x128xf32>
    %18 = vector.broadcast %17 : vector<1x128xf32> to vector<8x128xf32>
    %c0_16 = arith.constant 0 : index
    %c0_17 = arith.constant 0 : index
    %19 = vector.load %arg1[%c0_16, %c0_17] : memref<8x32xf32, #tpu.memory_space<vmem>>, vector<8x32xf32>
    %c0_i32 = arith.constant 0 : i32
    %c8_i32 = arith.constant 8 : i32
    %20 = arith.muli %c0_i32, %c8_i32 : i32
    %21 = tpu.assume_multiple %20, 8 : i32
    %cst_18 = arith.constant dense<0.000000e+00> : vector<8x128xf32>
    %22 = tpu.matmul %19, %15, %cst_18 {dimension_numbers = #tpu.dot_dimension_numbers<[1], [0], [0], [1], [0, 0, 1, 1], [], []>} : vector<8x32xf32>, vector<32x128xf32>, vector<8x128xf32> -> vector<8x128xf32>
    %23 = arith.addf %22, %18 : vector<8x128xf32>
    %24 = arith.index_cast %21 : i32 to index
    %c0_19 = arith.constant 0 : index
    %25 = vector.load %arg10[%24, %c0_19] : memref<64x128xf32, #tpu.memory_space<vmem>>, vector<8x128xf32>
    %26 = vector.extract_strided_slice %25 {offsets = [0, 0], sizes = [8, 64], strides = [1, 1]} : vector<8x128xf32> to vector<8x64xf32>
    %27 = vector.extract_strided_slice %23 {offsets = [0, 0], sizes = [8, 64], strides = [1, 1]} : vector<8x128xf32> to vector<8x64xf32>
    %28 = arith.addf %26, %27 : vector<8x64xf32>
    %29 = arith.negf %28 : vector<8x64xf32>
    %30 = math.exp %29 : vector<8x64xf32>
    %cst_20 = arith.constant 1.000000e+00 : f32
    %31 = vector.broadcast %cst_20 : f32 to vector<8x64xf32>
    %32 = arith.addf %31, %30 : vector<8x64xf32>
    %33 = arith.divf %31, %32 : vector<8x64xf32>
    %34 = vector.extract_strided_slice %33 {offsets = [0, 0], sizes = [8, 32], strides = [1, 1]} : vector<8x64xf32> to vector<8x32xf32>
    %35 = vector.extract_strided_slice %33 {offsets = [0, 32], sizes = [8, 32], strides = [1, 1]} : vector<8x64xf32> to vector<8x32xf32>
    %36 = vector.extract_strided_slice %25 {offsets = [0, 64], sizes = [8, 32], strides = [1, 1]} : vector<8x128xf32> to vector<8x32xf32>
    %37 = vector.extract_strided_slice %23 {offsets = [0, 64], sizes = [8, 32], strides = [1, 1]} : vector<8x128xf32> to vector<8x32xf32>
    %38 = arith.mulf %34, %37 : vector<8x32xf32>
    %39 = arith.addf %36, %38 : vector<8x32xf32>
    %40 = math.tanh %39 : vector<8x32xf32>
    %41 = arith.subf %19, %40 : vector<8x32xf32>
    %42 = arith.mulf %35, %41 : vector<8x32xf32>
    %43 = arith.addf %40, %42 : vector<8x32xf32>
    %44 = arith.index_cast %21 : i32 to index
    %c0_21 = arith.constant 0 : index
    %45 = vector.load %arg11[%44, %c0_21] : memref<64x32xf32, #tpu.memory_space<vmem>>, vector<8x32xf32>
    tpu.vector_store %arg11[%44, %c0_21], %43 {strides = array<i32>} : memref<64x32xf32, #tpu.memory_space<vmem>>, vector<8x32xf32>,
    %c1_i32 = arith.constant 1 : i32
    %c8_i32_22 = arith.constant 8 : i32
    %46 = arith.muli %c1_i32, %c8_i32_22 : i32
    %47 = tpu.assume_multiple %46, 8 : i32
    %cst_23 = arith.constant dense<0.000000e+00> : vector<8x128xf32>
    %48 = tpu.matmul %43, %15, %cst_23 {dimension_numbers = #tpu.dot_dimension_numbers<[1], [0], [0], [1], [0, 0, 1, 1], [], []>} : vector<8x32xf32>, vector<32x128xf32>, vector<8x128xf32> -> vector<8x128xf32>
    %49 = arith.addf %48, %18 : vector<8x128xf32>
    %50 = arith.index_cast %47 : i32 to index
    %c0_24 = arith.constant 0 : index
    %51 = vector.load %arg10[%50, %c0_24] : memref<64x128xf32, #tpu.memory_space<vmem>>, vector<8x128xf32>
    %52 = vector.extract_strided_slice %51 {offsets = [0, 0], sizes = [8, 64], strides = [1, 1]} : vector<8x128xf32> to vector<8x64xf32>
    %53 = vector.extract_strided_slice %49 {offsets = [0, 0], sizes = [8, 64], strides = [1, 1]} : vector<8x128xf32> to vector<8x64xf32>
    %54 = arith.addf %52, %53 : vector<8x64xf32>
    %55 = arith.negf %54 : vector<8x64xf32>
    %56 = math.exp %55 : vector<8x64xf32>
    %cst_25 = arith.constant 1.000000e+00 : f32
    %57 = vector.broadcast %cst_25 : f32 to vector<8x64xf32>
    %58 = arith.addf %57, %56 : vector<8x64xf32>
    %59 = arith.divf %57, %58 : vector<8x64xf32>
    %60 = vector.extract_strided_slice %59 {offsets = [0, 0], sizes = [8, 32], strides = [1, 1]} : vector<8x64xf32> to vector<8x32xf32>
    %61 = vector.extract_strided_slice %59 {offsets = [0, 32], sizes = [8, 32], strides = [1, 1]} : vector<8x64xf32> to vector<8x32xf32>
    %62 = vector.extract_strided_slice %51 {offsets = [0, 64], sizes = [8, 32], strides = [1, 1]} : vector<8x128xf32> to vector<8x32xf32>
    %63 = vector.extract_strided_slice %49 {offsets = [0, 64], sizes = [8, 32], strides = [1, 1]} : vector<8x128xf32> to vector<8x32xf32>
    %64 = arith.mulf %60, %63 : vector<8x32xf32>
    %65 = arith.addf %62, %64 : vector<8x32xf32>
    %66 = math.tanh %65 : vector<8x32xf32>
    %67 = arith.subf %43, %66 : vector<8x32xf32>
    %68 = arith.mulf %61, %67 : vector<8x32xf32>
    %69 = arith.addf %66, %68 : vector<8x32xf32>
    %70 = arith.index_cast %47 : i32 to index
    %c0_26 = arith.constant 0 : index
    %71 = vector.load %arg11[%70, %c0_26] : memref<64x32xf32, #tpu.memory_space<vmem>>, vector<8x32xf32>
    tpu.vector_store %arg11[%70, %c0_26], %69 {strides = array<i32>} : memref<64x32xf32, #tpu.memory_space<vmem>>, vector<8x32xf32>,
    %c2_i32 = arith.constant 2 : i32
    %c8_i32_27 = arith.constant 8 : i32
    %72 = arith.muli %c2_i32, %c8_i32_27 : i32
    %73 = tpu.assume_multiple %72, 8 : i32
    %cst_28 = arith.constant dense<0.000000e+00> : vector<8x128xf32>
    %74 = tpu.matmul %69, %15, %cst_28 {dimension_numbers = #tpu.dot_dimension_numbers<[1], [0], [0], [1], [0, 0, 1, 1], [], []>} : vector<8x32xf32>, vector<32x128xf32>, vector<8x128xf32> -> vector<8x128xf32>
    %75 = arith.addf %74, %18 : vector<8x128xf32>
    %76 = arith.index_cast %73 : i32 to index
    %c0_29 = arith.constant 0 : index
    %77 = vector.load %arg10[%76, %c0_29] : memref<64x128xf32, #tpu.memory_space<vmem>>, vector<8x128xf32>
    %78 = vector.extract_strided_slice %77 {offsets = [0, 0], sizes = [8, 64], strides = [1, 1]} : vector<8x128xf32> to vector<8x64xf32>
    %79 = vector.extract_strided_slice %75 {offsets = [0, 0], sizes = [8, 64], strides = [1, 1]} : vector<8x128xf32> to vector<8x64xf32>
    %80 = arith.addf %78, %79 : vector<8x64xf32>
    %81 = arith.negf %80 : vector<8x64xf32>
    %82 = math.exp %81 : vector<8x64xf32>
    %cst_30 = arith.constant 1.000000e+00 : f32
    %83 = vector.broadcast %cst_30 : f32 to vector<8x64xf32>
    %84 = arith.addf %83, %82 : vector<8x64xf32>
    %85 = arith.divf %83, %84 : vector<8x64xf32>
    %86 = vector.extract_strided_slice %85 {offsets = [0, 0], sizes = [8, 32], strides = [1, 1]} : vector<8x64xf32> to vector<8x32xf32>
    %87 = vector.extract_strided_slice %85 {offsets = [0, 32], sizes = [8, 32], strides = [1, 1]} : vector<8x64xf32> to vector<8x32xf32>
    %88 = vector.extract_strided_slice %77 {offsets = [0, 64], sizes = [8, 32], strides = [1, 1]} : vector<8x128xf32> to vector<8x32xf32>
    %89 = vector.extract_strided_slice %75 {offsets = [0, 64], sizes = [8, 32], strides = [1, 1]} : vector<8x128xf32> to vector<8x32xf32>
    %90 = arith.mulf %86, %89 : vector<8x32xf32>
    %91 = arith.addf %88, %90 : vector<8x32xf32>
    %92 = math.tanh %91 : vector<8x32xf32>
    %93 = arith.subf %69, %92 : vector<8x32xf32>
    %94 = arith.mulf %87, %93 : vector<8x32xf32>
    %95 = arith.addf %92, %94 : vector<8x32xf32>
    %96 = arith.index_cast %73 : i32 to index
    %c0_31 = arith.constant 0 : index
    %97 = vector.load %arg11[%96, %c0_31] : memref<64x32xf32, #tpu.memory_space<vmem>>, vector<8x32xf32>
    tpu.vector_store %arg11[%96, %c0_31], %95 {strides = array<i32>} : memref<64x32xf32, #tpu.memory_space<vmem>>, vector<8x32xf32>,
    %c3_i32 = arith.constant 3 : i32
    %c8_i32_32 = arith.constant 8 : i32
    %98 = arith.muli %c3_i32, %c8_i32_32 : i32
    %99 = tpu.assume_multiple %98, 8 : i32
    %cst_33 = arith.constant dense<0.000000e+00> : vector<8x128xf32>
    %100 = tpu.matmul %95, %15, %cst_33 {dimension_numbers = #tpu.dot_dimension_numbers<[1], [0], [0], [1], [0, 0, 1, 1], [], []>} : vector<8x32xf32>, vector<32x128xf32>, vector<8x128xf32> -> vector<8x128xf32>
    %101 = arith.addf %100, %18 : vector<8x128xf32>
    %102 = arith.index_cast %99 : i32 to index
    %c0_34 = arith.constant 0 : index
    %103 = vector.load %arg10[%102, %c0_34] : memref<64x128xf32, #tpu.memory_space<vmem>>, vector<8x128xf32>
    %104 = vector.extract_strided_slice %103 {offsets = [0, 0], sizes = [8, 64], strides = [1, 1]} : vector<8x128xf32> to vector<8x64xf32>
    %105 = vector.extract_strided_slice %101 {offsets = [0, 0], sizes = [8, 64], strides = [1, 1]} : vector<8x128xf32> to vector<8x64xf32>
    %106 = arith.addf %104, %105 : vector<8x64xf32>
    %107 = arith.negf %106 : vector<8x64xf32>
    %108 = math.exp %107 : vector<8x64xf32>
    %cst_35 = arith.constant 1.000000e+00 : f32
    %109 = vector.broadcast %cst_35 : f32 to vector<8x64xf32>
    %110 = arith.addf %109, %108 : vector<8x64xf32>
    %111 = arith.divf %109, %110 : vector<8x64xf32>
    %112 = vector.extract_strided_slice %111 {offsets = [0, 0], sizes = [8, 32], strides = [1, 1]} : vector<8x64xf32> to vector<8x32xf32>
    %113 = vector.extract_strided_slice %111 {offsets = [0, 32], sizes = [8, 32], strides = [1, 1]} : vector<8x64xf32> to vector<8x32xf32>
    %114 = vector.extract_strided_slice %103 {offsets = [0, 64], sizes = [8, 32], strides = [1, 1]} : vector<8x128xf32> to vector<8x32xf32>
    %115 = vector.extract_strided_slice %101 {offsets = [0, 64], sizes = [8, 32], strides = [1, 1]} : vector<8x128xf32> to vector<8x32xf32>
    %116 = arith.mulf %112, %115 : vector<8x32xf32>
    %117 = arith.addf %114, %116 : vector<8x32xf32>
    %118 = math.tanh %117 : vector<8x32xf32>
    %119 = arith.subf %95, %118 : vector<8x32xf32>
    %120 = arith.mulf %113, %119 : vector<8x32xf32>
    %121 = arith.addf %118, %120 : vector<8x32xf32>
    %122 = arith.index_cast %99 : i32 to index
    %c0_36 = arith.constant 0 : index
    %123 = vector.load %arg11[%122, %c0_36] : memref<64x32xf32, #tpu.memory_space<vmem>>, vector<8x32xf32>
    tpu.vector_store %arg11[%122, %c0_36], %121 {strides = array<i32>} : memref<64x32xf32, #tpu.memory_space<vmem>>, vector<8x32xf32>,
    %c4_i32 = arith.constant 4 : i32
    %c8_i32_37 = arith.constant 8 : i32
    %124 = arith.muli %c4_i32, %c8_i32_37 : i32
    %125 = tpu.assume_multiple %124, 8 : i32
    %cst_38 = arith.constant dense<0.000000e+00> : vector<8x128xf32>
    %126 = tpu.matmul %121, %15, %cst_38 {dimension_numbers = #tpu.dot_dimension_numbers<[1], [0], [0], [1], [0, 0, 1, 1], [], []>} : vector<8x32xf32>, vector<32x128xf32>, vector<8x128xf32> -> vector<8x128xf32>
    %127 = arith.addf %126, %18 : vector<8x128xf32>
    %128 = arith.index_cast %125 : i32 to index
    %c0_39 = arith.constant 0 : index
    %129 = vector.load %arg10[%128, %c0_39] : memref<64x128xf32, #tpu.memory_space<vmem>>, vector<8x128xf32>
    %130 = vector.extract_strided_slice %129 {offsets = [0, 0], sizes = [8, 64], strides = [1, 1]} : vector<8x128xf32> to vector<8x64xf32>
    %131 = vector.extract_strided_slice %127 {offsets = [0, 0], sizes = [8, 64], strides = [1, 1]} : vector<8x128xf32> to vector<8x64xf32>
    %132 = arith.addf %130, %131 : vector<8x64xf32>
    %133 = arith.negf %132 : vector<8x64xf32>
    %134 = math.exp %133 : vector<8x64xf32>
    %cst_40 = arith.constant 1.000000e+00 : f32
    %135 = vector.broadcast %cst_40 : f32 to vector<8x64xf32>
    %136 = arith.addf %135, %134 : vector<8x64xf32>
    %137 = arith.divf %135, %136 : vector<8x64xf32>
    %138 = vector.extract_strided_slice %137 {offsets = [0, 0], sizes = [8, 32], strides = [1, 1]} : vector<8x64xf32> to vector<8x32xf32>
    %139 = vector.extract_strided_slice %137 {offsets = [0, 32], sizes = [8, 32], strides = [1, 1]} : vector<8x64xf32> to vector<8x32xf32>
    %140 = vector.extract_strided_slice %129 {offsets = [0, 64], sizes = [8, 32], strides = [1, 1]} : vector<8x128xf32> to vector<8x32xf32>
    %141 = vector.extract_strided_slice %127 {offsets = [0, 64], sizes = [8, 32], strides = [1, 1]} : vector<8x128xf32> to vector<8x32xf32>
    %142 = arith.mulf %138, %141 : vector<8x32xf32>
    %143 = arith.addf %140, %142 : vector<8x32xf32>
    %144 = math.tanh %143 : vector<8x32xf32>
    %145 = arith.subf %121, %144 : vector<8x32xf32>
    %146 = arith.mulf %139, %145 : vector<8x32xf32>
    %147 = arith.addf %144, %146 : vector<8x32xf32>
    %148 = arith.index_cast %125 : i32 to index
    %c0_41 = arith.constant 0 : index
    %149 = vector.load %arg11[%148, %c0_41] : memref<64x32xf32, #tpu.memory_space<vmem>>, vector<8x32xf32>
    tpu.vector_store %arg11[%148, %c0_41], %147 {strides = array<i32>} : memref<64x32xf32, #tpu.memory_space<vmem>>, vector<8x32xf32>,
    %c5_i32 = arith.constant 5 : i32
    %c8_i32_42 = arith.constant 8 : i32
    %150 = arith.muli %c5_i32, %c8_i32_42 : i32
    %151 = tpu.assume_multiple %150, 8 : i32
    %cst_43 = arith.constant dense<0.000000e+00> : vector<8x128xf32>
    %152 = tpu.matmul %147, %15, %cst_43 {dimension_numbers = #tpu.dot_dimension_numbers<[1], [0], [0], [1], [0, 0, 1, 1], [], []>} : vector<8x32xf32>, vector<32x128xf32>, vector<8x128xf32> -> vector<8x128xf32>
    %153 = arith.addf %152, %18 : vector<8x128xf32>
    %154 = arith.index_cast %151 : i32 to index
    %c0_44 = arith.constant 0 : index
    %155 = vector.load %arg10[%154, %c0_44] : memref<64x128xf32, #tpu.memory_space<vmem>>, vector<8x128xf32>
    %156 = vector.extract_strided_slice %155 {offsets = [0, 0], sizes = [8, 64], strides = [1, 1]} : vector<8x128xf32> to vector<8x64xf32>
    %157 = vector.extract_strided_slice %153 {offsets = [0, 0], sizes = [8, 64], strides = [1, 1]} : vector<8x128xf32> to vector<8x64xf32>
    %158 = arith.addf %156, %157 : vector<8x64xf32>
    %159 = arith.negf %158 : vector<8x64xf32>
    %160 = math.exp %159 : vector<8x64xf32>
    %cst_45 = arith.constant 1.000000e+00 : f32
    %161 = vector.broadcast %cst_45 : f32 to vector<8x64xf32>
    %162 = arith.addf %161, %160 : vector<8x64xf32>
    %163 = arith.divf %161, %162 : vector<8x64xf32>
    %164 = vector.extract_strided_slice %163 {offsets = [0, 0], sizes = [8, 32], strides = [1, 1]} : vector<8x64xf32> to vector<8x32xf32>
    %165 = vector.extract_strided_slice %163 {offsets = [0, 32], sizes = [8, 32], strides = [1, 1]} : vector<8x64xf32> to vector<8x32xf32>
    %166 = vector.extract_strided_slice %155 {offsets = [0, 64], sizes = [8, 32], strides = [1, 1]} : vector<8x128xf32> to vector<8x32xf32>
    %167 = vector.extract_strided_slice %153 {offsets = [0, 64], sizes = [8, 32], strides = [1, 1]} : vector<8x128xf32> to vector<8x32xf32>
    %168 = arith.mulf %164, %167 : vector<8x32xf32>
    %169 = arith.addf %166, %168 : vector<8x32xf32>
    %170 = math.tanh %169 : vector<8x32xf32>
    %171 = arith.subf %147, %170 : vector<8x32xf32>
    %172 = arith.mulf %165, %171 : vector<8x32xf32>
    %173 = arith.addf %170, %172 : vector<8x32xf32>
    %174 = arith.index_cast %151 : i32 to index
    %c0_46 = arith.constant 0 : index
    %175 = vector.load %arg11[%174, %c0_46] : memref<64x32xf32, #tpu.memory_space<vmem>>, vector<8x32xf32>
    tpu.vector_store %arg11[%174, %c0_46], %173 {strides = array<i32>} : memref<64x32xf32, #tpu.memory_space<vmem>>, vector<8x32xf32>,
    %c6_i32 = arith.constant 6 : i32
    %c8_i32_47 = arith.constant 8 : i32
    %176 = arith.muli %c6_i32, %c8_i32_47 : i32
    %177 = tpu.assume_multiple %176, 8 : i32
    %cst_48 = arith.constant dense<0.000000e+00> : vector<8x128xf32>
    %178 = tpu.matmul %173, %15, %cst_48 {dimension_numbers = #tpu.dot_dimension_numbers<[1], [0], [0], [1], [0, 0, 1, 1], [], []>} : vector<8x32xf32>, vector<32x128xf32>, vector<8x128xf32> -> vector<8x128xf32>
    %179 = arith.addf %178, %18 : vector<8x128xf32>
    %180 = arith.index_cast %177 : i32 to index
    %c0_49 = arith.constant 0 : index
    %181 = vector.load %arg10[%180, %c0_49] : memref<64x128xf32, #tpu.memory_space<vmem>>, vector<8x128xf32>
    %182 = vector.extract_strided_slice %181 {offsets = [0, 0], sizes = [8, 64], strides = [1, 1]} : vector<8x128xf32> to vector<8x64xf32>
    %183 = vector.extract_strided_slice %179 {offsets = [0, 0], sizes = [8, 64], strides = [1, 1]} : vector<8x128xf32> to vector<8x64xf32>
    %184 = arith.addf %182, %183 : vector<8x64xf32>
    %185 = arith.negf %184 : vector<8x64xf32>
    %186 = math.exp %185 : vector<8x64xf32>
    %cst_50 = arith.constant 1.000000e+00 : f32
    %187 = vector.broadcast %cst_50 : f32 to vector<8x64xf32>
    %188 = arith.addf %187, %186 : vector<8x64xf32>
    %189 = arith.divf %187, %188 : vector<8x64xf32>
    %190 = vector.extract_strided_slice %189 {offsets = [0, 0], sizes = [8, 32], strides = [1, 1]} : vector<8x64xf32> to vector<8x32xf32>
    %191 = vector.extract_strided_slice %189 {offsets = [0, 32], sizes = [8, 32], strides = [1, 1]} : vector<8x64xf32> to vector<8x32xf32>
    %192 = vector.extract_strided_slice %181 {offsets = [0, 64], sizes = [8, 32], strides = [1, 1]} : vector<8x128xf32> to vector<8x32xf32>
    %193 = vector.extract_strided_slice %179 {offsets = [0, 64], sizes = [8, 32], strides = [1, 1]} : vector<8x128xf32> to vector<8x32xf32>
    %194 = arith.mulf %190, %193 : vector<8x32xf32>
    %195 = arith.addf %192, %194 : vector<8x32xf32>
    %196 = math.tanh %195 : vector<8x32xf32>
    %197 = arith.subf %173, %196 : vector<8x32xf32>
    %198 = arith.mulf %191, %197 : vector<8x32xf32>
    %199 = arith.addf %196, %198 : vector<8x32xf32>
    %200 = arith.index_cast %177 : i32 to index
    %c0_51 = arith.constant 0 : index
    %201 = vector.load %arg11[%200, %c0_51] : memref<64x32xf32, #tpu.memory_space<vmem>>, vector<8x32xf32>
    tpu.vector_store %arg11[%200, %c0_51], %199 {strides = array<i32>} : memref<64x32xf32, #tpu.memory_space<vmem>>, vector<8x32xf32>,
    %c7_i32 = arith.constant 7 : i32
    %c8_i32_52 = arith.constant 8 : i32
    %202 = arith.muli %c7_i32, %c8_i32_52 : i32
    %203 = tpu.assume_multiple %202, 8 : i32
    %cst_53 = arith.constant dense<0.000000e+00> : vector<8x128xf32>
    %204 = tpu.matmul %199, %15, %cst_53 {dimension_numbers = #tpu.dot_dimension_numbers<[1], [0], [0], [1], [0, 0, 1, 1], [], []>} : vector<8x32xf32>, vector<32x128xf32>, vector<8x128xf32> -> vector<8x128xf32>
    %205 = arith.addf %204, %18 : vector<8x128xf32>
    %206 = arith.index_cast %203 : i32 to index
    %c0_54 = arith.constant 0 : index
    %207 = vector.load %arg10[%206, %c0_54] : memref<64x128xf32, #tpu.memory_space<vmem>>, vector<8x128xf32>
    %208 = vector.extract_strided_slice %207 {offsets = [0, 0], sizes = [8, 64], strides = [1, 1]} : vector<8x128xf32> to vector<8x64xf32>
    %209 = vector.extract_strided_slice %205 {offsets = [0, 0], sizes = [8, 64], strides = [1, 1]} : vector<8x128xf32> to vector<8x64xf32>
    %210 = arith.addf %208, %209 : vector<8x64xf32>
    %211 = arith.negf %210 : vector<8x64xf32>
    %212 = math.exp %211 : vector<8x64xf32>
    %cst_55 = arith.constant 1.000000e+00 : f32
    %213 = vector.broadcast %cst_55 : f32 to vector<8x64xf32>
    %214 = arith.addf %213, %212 : vector<8x64xf32>
    %215 = arith.divf %213, %214 : vector<8x64xf32>
    %216 = vector.extract_strided_slice %215 {offsets = [0, 0], sizes = [8, 32], strides = [1, 1]} : vector<8x64xf32> to vector<8x32xf32>
    %217 = vector.extract_strided_slice %215 {offsets = [0, 32], sizes = [8, 32], strides = [1, 1]} : vector<8x64xf32> to vector<8x32xf32>
    %218 = vector.extract_strided_slice %207 {offsets = [0, 64], sizes = [8, 32], strides = [1, 1]} : vector<8x128xf32> to vector<8x32xf32>
    %219 = vector.extract_strided_slice %205 {offsets = [0, 64], sizes = [8, 32], strides = [1, 1]} : vector<8x128xf32> to vector<8x32xf32>
    %220 = arith.mulf %216, %219 : vector<8x32xf32>
    %221 = arith.addf %218, %220 : vector<8x32xf32>
    %222 = math.tanh %221 : vector<8x32xf32>
    %223 = arith.subf %199, %222 : vector<8x32xf32>
    %224 = arith.mulf %217, %223 : vector<8x32xf32>
    %225 = arith.addf %222, %224 : vector<8x32xf32>
    %226 = arith.index_cast %203 : i32 to index
    %c0_56 = arith.constant 0 : index
    %227 = vector.load %arg11[%226, %c0_56] : memref<64x32xf32, #tpu.memory_space<vmem>>, vector<8x32xf32>
    tpu.vector_store %arg11[%226, %c0_56], %225 {strides = array<i32>} : memref<64x32xf32, #tpu.memory_space<vmem>>, vector<8x32xf32>,
    %c8_i32_57 = arith.constant 8 : i32
    %c0_58 = arith.constant 0 : index
    %c0_59 = arith.constant 0 : index
    %228 = vector.load %arg9[%c0_58, %c0_59] : memref<8x32xf32, #tpu.memory_space<vmem>>, vector<8x32xf32>
    tpu.vector_store %arg9[%c0_58, %c0_59], %225 {strides = array<i32>} : memref<8x32xf32, #tpu.memory_space<vmem>>, vector<8x32xf32>,
    %c0_60 = arith.constant 0 : index
    %c0_61 = arith.constant 0 : index
    %229 = vector.load %arg11[%c0_60, %c0_61] : memref<64x32xf32, #tpu.memory_space<vmem>>, vector<64x32xf32>
    %c0_62 = arith.constant 0 : index
    %c0_63 = arith.constant 0 : index
    %230 = vector.load %arg5[%c0_62, %c0_63] : memref<32x32xf32, #tpu.memory_space<vmem>>, vector<32x32xf32>
    %cst_64 = arith.constant dense<0.000000e+00> : vector<64x32xf32>
    %231 = tpu.matmul %229, %230, %cst_64 {dimension_numbers = #tpu.dot_dimension_numbers<[1], [0], [0], [1], [0, 0, 1, 1], [], []>} : vector<64x32xf32>, vector<32x32xf32>, vector<64x32xf32> -> vector<64x32xf32>
    %232 = vector.broadcast %2 : vector<1x32xf32> to vector<64x32xf32>
    %233 = arith.addf %231, %232 : vector<64x32xf32>
    %234 = math.tanh %233 : vector<64x32xf32>
    %c0_65 = arith.constant 0 : index
    %c0_66 = arith.constant 0 : index
    %235 = vector.load %arg6[%c0_65, %c0_66] : memref<32x128xf32, #tpu.memory_space<vmem>>, vector<32x128xf32>
    %cst_67 = arith.constant dense<0.000000e+00> : vector<64x128xf32>
    %236 = tpu.matmul %234, %235, %cst_67 {dimension_numbers = #tpu.dot_dimension_numbers<[1], [0], [0], [1], [0, 0, 1, 1], [], []>} : vector<64x32xf32>, vector<32x128xf32>, vector<64x128xf32> -> vector<64x128xf32>
    %237 = vector.broadcast %3 : vector<1x128xf32> to vector<64x128xf32>
    %238 = arith.addf %236, %237 : vector<64x128xf32>
    %cst_68 = arith.constant dense<0xFF800000> : vector<64xf32>
    %239 = vector.multi_reduction <maximumf>, %238, %cst_68 [1] : vector<64x128xf32> to vector<64xf32>
    %240 = vector.shape_cast %239 : vector<64xf32> to vector<64x1xf32>
    %241 = vector.broadcast %240 : vector<64x1xf32> to vector<64x128xf32>
    %242 = arith.subf %238, %241 : vector<64x128xf32>
    %243 = math.exp %242 : vector<64x128xf32>
    %cst_69 = arith.constant dense<0.000000e+00> : vector<64xf32>
    %244 = vector.multi_reduction <add>, %243, %cst_69 [1] : vector<64x128xf32> to vector<64xf32>
    %245 = vector.shape_cast %244 : vector<64xf32> to vector<64x1xf32>
    %246 = vector.broadcast %245 : vector<64x1xf32> to vector<64x128xf32>
    %247 = arith.divf %243, %246 : vector<64x128xf32>
    %c0_70 = arith.constant 0 : index
    %c0_71 = arith.constant 0 : index
    %248 = vector.load %arg8[%c0_70, %c0_71] : memref<64x128xf32, #tpu.memory_space<vmem>>, vector<64x128xf32>
    tpu.vector_store %arg8[%c0_70, %c0_71], %247 {strides = array<i32>} : memref<64x128xf32, #tpu.memory_space<vmem>>, vector<64x128xf32>,
    return
  }
}

</mosaic_0001>

<bundles_post_ra>
// kernel: tpu_custom_call.1
= control target key start
LH: loop header
LB: loop body
LE: loop exit
PB: predicated region body
PF: predicated region fallthrough
CT: control target
= control target key end

     0   :  { %15 = vsyncpa [#allocation5], 0  ;;  %s1950_s0 = inlined_call_operand.vmem [shape: f32[64,16], index: 0, kind: input, shape index: {}]   ;;  %s1951_s1 = inlined_call_operand.hbm [shape: f32[8,32], index: 1, kind: input, shape index: {}]   ;;  %s1952_s2 = inlined_call_operand.vmem [shape: f32[16,32], index: 2, kind: input, shape index: {}]   ;;  %s1953_s3 = inlined_call_operand.vmem [shape: f32[32,128], index: 3, kind: input, shape index: {}]   ;;  %s1954_s4 = inlined_call_operand.vmem [shape: f32[32,128], index: 4, kind: input, shape index: {}]   ;;  %s1955_s5 = inlined_call_operand.hbm [shape: f32[32,32], index: 5, kind: input, shape index: {}]   ;;  %s1956_s6 = inlined_call_operand.hbm [shape: f32[32,128], index: 6, kind: input, shape index: {}]   ;;  %s1957_s7 = inlined_call_operand.hbm [shape: f32[8,128], index: 7, kind: input, shape index: {}]   ;;  %s1958_s8 = inlined_call_operand.hbm [shape: f32[64,128], index: 8, kind: output, shape index: {0}]   ;;  %s1959_s9 = inlined_call_operand.hbm [shape: f32[8,32], index: 9, kind: output, shape index: {1}]  }
   0x1   :  { %16 = vsyncpa [#allocation8], 0 }
   0x2   :  { %17 = vsyncpa [#allocation11], 0 }
   0x3   :  { %18 = vsyncpa [#allocation6], 0  ;;  %s43_s11 = sshll.u32 %s1955_s5, 4  ;;  %s44_s11 = int_to_ptr.hbm [resolvable:$true] %s43_s11 }
   0x4   :  { %19 = vsyncpa [#allocation14], 0  ;;  %s1562_s12 = smov [#allocation7]   ;;  %s27_s16 = sshll.u32 %s1951_s1, 4  ;;  %s28_s16 = int_to_ptr.hbm [resolvable:$true] %s27_s16 }
   0x5   :  { %s45_s13 = sshll.u32 %s1562_s12, 4  ;;  %s1563_s17 = smov 128   ;;  %s46_s13 = int_to_ptr.vmem [resolvable:$true] %s45_s13 }
   0x6   :  { %s1564_s18 = smov 8   ;;  %s1565_s19 = smov [#allocation4]  }
   0x7   :  { %51 = dma.hbm_to_vmem [thread:$0]  %s44_s11, 512, %s46_s13, [#allocation8], %s1563_s17, %s1563_s17, %s1564_s18  }
   0x8   :  { %s29_s20 = sshll.u32 %s1565_s19, 4  ;;  %s56_s22 = sshll.u32 %s1956_s6, 4  ;;  %s30_s20 = int_to_ptr.vmem [resolvable:$true] %s29_s20  ;;  %s57_s22 = int_to_ptr.hbm [resolvable:$true] %s56_s22 }
   0x9   :  { %32 = dma.hbm_to_vmem [thread:$0]  %s28_s16, 128, %s30_s20, [#allocation5]  }
   0xa   :  { %s70_s1 = sshll.u32 %s1957_s7, 4  ;;  %s1566_s25 = smov [#allocation9]   ;;  %s71_s1 = int_to_ptr.hbm [resolvable:$true] %s70_s1 }
   0xb   :  { %s58_s26 = sshll.u32 %s1566_s25, 4  ;;  %s1567_s27 = smov [#allocation10]   ;;  %s59_s26 = int_to_ptr.vmem [resolvable:$true] %s58_s26 }
   0xc   :  { %64 = dma.hbm_to_vmem [thread:$0]  %s57_s22, 512, %s59_s26, [#allocation8], %s1563_s17, %s1563_s17, %s1564_s18  }
   0xd   :  { %s72_s28 = sshll.u32 %s1567_s27, 4  ;;  %s73_s28 = int_to_ptr.vmem [resolvable:$true] %s72_s28 }
   0xe   :  { %75 = dma.hbm_to_vmem [thread:$0]  %s71_s1, 128, %s73_s28, [#allocation11]  }
   0xf   :  { %1552 = dma.done.wait [#allocation5], 128  }
  0x10   :  { %1553 = vsyncadd [#allocation5], 4294967168 }
  0x11   :  { %1554 = dma.done.wait [#allocation8], 1024  }
  0x12   :  { %1555 = vsyncadd [#allocation8], 4294966272 }
  0x13   :  { %1556 = dma.done.wait [#allocation11], 128  }
  0x14   :  { %1557 = vsyncadd [#allocation11], 4294967168  ;;  %v105_v0 = vld [vmem:[%s1952_s2 + $0x8] sm:$0xff]  ;;  %v104_v1 = vld [vmem:[%s1952_s2] sm:$0xff]  ;;  %vm107_vm0 = vcmask 130048   ;;  %vm186_vm1 = vcmask 261120  }
  0x15   :  { %146 = vmatpush.msra.mxu0 %v105_v0  ;;  %v96_v2 = vld [vmem:[%s1950_s0] sm:$0xff]  ;;  %v1653_v3 = vld [vmem:[%s1954_s4 + $0x18] sm:$0xff]  ;;  %v1658_v4 = vld [vmem:[%s1954_s4 + $0x10] sm:$0xff]  ;;  %s1568_s26 = smov 64   ;;  %s1571_s19 = smov [#allocation13]  }
  0x16   :  { %282 = vmatpush.msra.mxu2 %v1653_v3  ;;  %356 = vmatpush.msra.mxu3 %v1653_v3  ;;  %v1665_v5 = vld [vmem:[%s1954_s4 + $0x8] sm:$0xff]  ;;  %v1672_v6 = vld [vmem:[%s1954_s4] sm:$0xff]  ;;  %v184_v8 = vld [vmem:[%s1953_s3 + $0x18] sm:$0xff]  ;;  %s1205_s20 = sshll.u32 %s1571_s19, 4  ;;  %s1207_s5 = sshll.u32 %s1959_s9, 4  ;;  %s1206_s20 = int_to_ptr.vmem [resolvable:$true] %s1205_s20  ;;  %s1208_s5 = int_to_ptr.hbm [resolvable:$true] %s1207_s5 }
  0x17   :  { %147 = vmatpush.msra.mxu0 %v104_v1  ;;  %v1676_v7 = vld [vmem:[#allocation4] sm:$0xff]  ;;  %223 = vmatpush.msra.mxu1 %v184_v8  ;;  %v183_v9 = vld [vmem:[%s1953_s3 + $0x10] sm:$0xff]  ;;  %v182_v10 = vld [vmem:[%s1953_s3 + $0x8] sm:$0xff]  ;;  %s1572_s9 = smov [#allocation12]   ;;  %s1193_s1 = sshll.u32 %s1958_s8, 4  ;;  %s1194_s1 = int_to_ptr.hbm [resolvable:$true] %s1193_s1 }
  0x18   :  { %1224 = vmatmul.msk.f32.vlgmr.msra.gmra.mxu0 %vm107_vm0, %v96_v2  ;;  %283 = vmatpush.msra.mxu2 %v1658_v4  ;;  %v181_v11 = vld [vmem:[%s1953_s3] sm:$0xff]  ;;  %v1707_v12 = vld [vmem:[#allocation10] ss:$0 sm:$0xff]  ;;  %v1710_v15 = vld [vmem:[#allocation10 + $0x2] ss:$0 sm:$0xff]  ;;  %s1569_s3 = smov 32  }
  0x19   :  { %357 = vmatpush.msra.mxu3 %v1658_v4  ;;  %224 = vmatpush.msra.mxu1 %v183_v9  ;;  %v1715_v19 = vld [vmem:[#allocation10 + $0x1] ss:$0 sm:$0xff]  ;;  %v98_v46 = vld [vmem:[%s1950_s0 + $0x10] sm:$0xff]  ;;  %v99_v47 = vld [vmem:[%s1950_s0 + $0x18] sm:$0xff]  ;;  %s1191_s22 = sshll.u32 %s1572_s9, 4  ;;  %s1192_s22 = int_to_ptr.vmem [resolvable:$true] %s1191_s22 }
  0x1a   :  { %284 = vmatpush.msra.mxu2 %v1665_v5  ;;  %v97_v43 = vld [vmem:[%s1950_s0 + $0x8] sm:$0xff]  ;;  %v100_v48 = vld [vmem:[%s1950_s0 + $0x20] sm:$0xff]  ;;  %v102_v52 = vld [vmem:[%s1950_s0 + $0x30] sm:$0xff] }
  0x1b   :  { %358 = vmatpush.msra.mxu3 %v1665_v5  ;;  %225 = vmatpush.msra.mxu1 %v182_v10  ;;  %v101_v49 = vld [vmem:[%s1950_s0 + $0x28] sm:$0xff]  ;;  %v103_v56 = vld [vmem:[%s1950_s0 + $0x38] sm:$0xff]  ;;  %v1757_v57 = vld [vmem:[#allocation7 + $0x18] sm:$0xff]  ;;  %s1570_s0 = smov 96  }
  0x1c   :  { %285 = vmatpush.msra.mxu2 %v1672_v6  ;;  %v1759_v58 = vld [vmem:[#allocation7 + $0x10] sm:$0xff]  ;;  %896 = vmatpush.msrb.mxu0 %v1757_v57  ;;  %v1762_v59 = vld [vmem:[#allocation7 + $0x8] sm:$0xff]  ;;  %v1765_v60 = vld [vmem:[#allocation7] sm:$0xff] }
  0x1d   :  { %1240 = vmatmul.msk.f32.vlgmr.msra.gmra.mxu2 %vm186_vm1, %v1676_v7  ;;  %359 = vmatpush.msra.mxu3 %v1672_v6 }
  0x1e   :  { %428 = vmatpush.msrb.mxu2 %v1653_v3  ;;  %226 = vmatpush.msra.mxu1 %v181_v11 }
  0x1f   :  { %500 = vmatpush.msrb.mxu3 %v1653_v3  ;;  %897 = vmatpush.msrb.mxu0 %v1759_v58 }
  0x20   :  { %429 = vmatpush.msrb.mxu2 %v1658_v4  ;;  %1225 = vmatmul.msk.f32.gmra.mxu0 %vm107_vm0, %v97_v43 }
  0x21   :  { %501 = vmatpush.msrb.mxu3 %v1658_v4  ;;  %898 = vmatpush.msrb.mxu0 %v1762_v59 }
  0x22   :  { %430 = vmatpush.msrb.mxu2 %v1665_v5 }
  0x23   :  { %502 = vmatpush.msrb.mxu3 %v1665_v5  ;;  %899 = vmatpush.msrb.mxu0 %v1765_v60 }
  0x24   :  { %431 = vmatpush.msrb.mxu2 %v1672_v6 }
  0x25   :  { %503 = vmatpush.msrb.mxu3 %v1672_v6 }
  0x26   :  { %572 = vmatpush.msra.mxu2 %v1653_v3 }
  0x28   :  { %573 = vmatpush.msra.mxu2 %v1658_v4  ;;  %1226 = vmatmul.msk.f32.gmra.mxu0 %vm107_vm0, %v98_v46 }
  0x2a   :  { %574 = vmatpush.msra.mxu2 %v1665_v5 }
  0x2c   :  { %575 = vmatpush.msra.mxu2 %v1672_v6 }
  0x30   :  { %1227 = vmatmul.msk.f32.gmra.mxu0 %vm107_vm0, %v99_v47 }
  0x38   :  { %1228 = vmatmul.msk.f32.gmra.mxu0 %vm107_vm0, %v100_v48 }
  0x40   :  { %1229 = vmatmul.msk.f32.gmra.mxu0 %vm107_vm0, %v101_v49 }
  0x48   :  { %1230 = vmatmul.msk.f32.gmra.mxu0 %vm107_vm0, %v102_v52 }
  0x50   :  { %1231 = vmatmul.msk.f32.gmra.mxu0 %vm107_vm0, %v103_v56 }
  0x95   :  { %v149_v13 = vpop.f32.mrf.mxu0 }
  0x96   :  { %v150_v14 = vadd.f32 %v1707_v12, %v149_v13 }
  0x98   :  { %1296 = vtanh.f32 %v150_v14 }
  0x9d   :  { %v152_v53 = vpop.f32.mrf.mxu0 }
  0x9e   :  { %v1297_v16 = vpop.eup %1296  ;;  %v153_v54 = vadd.f32 %v1707_v12, %v152_v53 }
  0x9f   :  { %1232 = vmatmul.msk.f32.vlgmr.msra.gmra.mxu1 %vm186_vm1, %v1297_v16 }
  0xa0   :  { %v287_v17 = vpop.f32.mrf.mxu2 }
  0xa1   :  { %v288_v18 = vadd.f32 %v1710_v15, %v287_v17 }
  0xa3   :  { %312 = vrot.lane.b32.xlu0 %v288_v18, %s1568_s26 }
  0xa5   :  { %v155_v62 = vpop.f32.mrf.mxu0 }
  0xa6   :  { %v156_v63 = vadd.f32 %v1707_v12, %v155_v62 }
  0xad   :  { %v158_v1 = vpop.f32.mrf.mxu0 }
  0xb5   :  { %v161_v8 = vpop.f32.mrf.mxu0 }
  0xb6   :  { %v162_v10 = vadd.f32 %v1707_v12, %v161_v8 }
  0xbd   :  { %v164_v11 = vpop.f32.mrf.mxu0 }
  0xbe   :  { %v165_v14 = vadd.f32 %v1707_v12, %v164_v11 }
  0xc5   :  { %v167_v16 = vpop.f32.mrf.mxu0 }
 0x115   :  { %v313_v33 = vpop.permute.xlu0 %312 }
 0x11c   :  { %v228_v20 = vpop.f32.mrf.mxu1 }
 0x11d   :  { %v229_v21 = vadd.f32 %v1715_v19, %v228_v20 }
 0x11f   :  { %v291_v22 = vadd.f32 %v288_v18, %v229_v21  ;;  %v168_v18 = vadd.f32 %v1707_v12, %v167_v16 }
 0x121   :  { %v1241_v23 = vmul.f32 -1.442695, %v291_v22 }
 0x123   :  { %1298 = vpow2.f32 %v1241_v23 }
 0x129   :  { %v1299_v24 = vpop.eup %1298 }
 0x12a   :  { %v295_v25 = vadd.f32 1.0, %v1299_v24  ;;  %v1788_v24 = vld [vmem:[#allocation9 + $0x18] sm:$0xff] }
 0x12b   :  { %974 = vmatpush.msrb.mxu1 %v1788_v24 }
 0x12c   :  { %1300 = vrcp.f32 %v295_v25  ;;  %v307_v29 = vand.u32 2147483648, %v295_v25  ;;  %v305_v31 = vand.u32 2147483647, %v295_v25  ;;  %vm301_vm3 = vweird.f32 %v295_v25 }
 0x12e   :  { %v308_v34 = vor.u32 1.1754944e-38, %v307_v29  ;;  %vm306_vm5 = vcmp.eq.f32.partialorder %v305_v31, 8.507059e+37 }
 0x132   :  { %v1301_v26 = vpop.eup %1300 }
 0x133   :  { %v297_v27 = vmul.f32 %v1301_v26, %v295_v25  ;;  %vm302_vm2 = vweird.f32 %v1301_v26  ;;  %v1791_v25 = vld [vmem:[#allocation9 + $0x10] sm:$0xff] }
 0x134   :  { %vm303_vm4 = vmor %vm301_vm3, %vm302_vm2  ;;  %975 = vmatpush.msrb.mxu1 %v1791_v25 }
 0x135   :  { %v298_v28 = vsub.f32 1.0, %v297_v27  ;;  %v1797_v27 = vld [vmem:[#allocation9] sm:$0xff] }
 0x137   :  { %v299_v30 = vmul.f32 %v1301_v26, %v298_v28 }
 0x139   :  { %v300_v32 = vadd.f32 %v1301_v26, %v299_v30 }
 0x13b   :  { %v304_v35 = vsel %vm303_vm4, %v1301_v26, %v300_v32  ;;  %v1794_v26 = vld [vmem:[#allocation9 + $0x8] sm:$0xff] }
 0x13c   :  { %v309_v36 = vsel %vm306_vm5, %v308_v34, %v304_v35  ;;  %976 = vmatpush.msrb.mxu1 %v1794_v26 }
 0x13d   :  { %v315_v37 = vmul.f32 %v313_v33, %v309_v36 }
 0x13e   :  { %977 = vmatpush.msrb.mxu1 %v1797_v27 }
 0x13f   :  { %317 = vrot.lane.b32.xlu0 %v315_v37, %s1568_s26 }
 0x1b1   :  { %v318_v38 = vpop.permute.xlu0 %317 }
 0x1b2   :  { %v320_v39 = vadd.f32 %v318_v38, %v229_v21  ;;  %v170_v21 = vpop.f32.mrf.mxu0 }
 0x1b3   :  { %v171_v22 = vadd.f32 %v1707_v12, %v170_v21 }
 0x1b4   :  { %1302 = vtanh.f32 %v320_v39 }
 0x1b5   :  { %1304 = vtanh.f32 %v153_v54 }
 0x1b6   :  { %1306 = vtanh.f32 %v156_v63 }
 0x1ba   :  { %v1303_v40 = vpop.eup %1302 }
 0x1bb   :  { %323 = vrot.lane.b32.xlu1 %v1303_v40, %s1568_s26  ;;  %v1305_v55 = vpop.eup %1304 }
 0x1bc   :  { %1233 = vmatmul.msk.f32.gmra.mxu1 %vm186_vm1, %v1305_v55  ;;  %v1307_v2 = vpop.eup %1306 }
 0x1c4   :  { %1234 = vmatmul.msk.f32.gmra.mxu1 %vm186_vm1, %v1307_v2 }
 0x22d   :  { %v324_v41 = vpop.permute.xlu1 %323 }
 0x22e   :  { %v326_v42 = vsub.f32 %v1676_v7, %v324_v41  ;;  %v159_v7 = vadd.f32 %v1707_v12, %v158_v1  ;;  %v1800_v12 = vld [vmem:[#allocation10 + $0x3] ss:$0 sm:$0xff] }
 0x230   :  { %328 = vrot.lane.b32.xlu1 %v326_v42, %s1569_s3  ;;  %1308 = vtanh.f32 %v159_v7 }
 0x231   :  { %1310 = vtanh.f32 %v162_v10 }
 0x232   :  { %1312 = vtanh.f32 %v165_v14 }
 0x233   :  { %1314 = vtanh.f32 %v168_v18 }
 0x234   :  { %1316 = vtanh.f32 %v171_v22 }
 0x236   :  { %v1309_v9 = vpop.eup %1308 }
 0x237   :  { %1235 = vmatmul.msk.f32.gmra.mxu1 %vm186_vm1, %v1309_v9  ;;  %v1311_v13 = vpop.eup %1310 }
 0x238   :  { %v1313_v17 = vpop.eup %1312 }
 0x239   :  { %v1315_v20 = vpop.eup %1314  ;;  %v231_v33 = vpop.f32.mrf.mxu1 }
 0x23a   :  { %v1317_v23 = vpop.eup %1316  ;;  %v232_v34 = vadd.f32 %v1715_v19, %v231_v33 }
 0x23f   :  { %1236 = vmatmul.msk.f32.gmra.mxu1 %vm186_vm1, %v1311_v13 }
 0x241   :  { %v234_v10 = vpop.f32.mrf.mxu1 }
 0x242   :  { %v235_v11 = vadd.f32 %v1715_v19, %v234_v10 }
 0x247   :  { %1237 = vmatmul.msk.f32.gmra.mxu1 %vm186_vm1, %v1313_v17 }
 0x24f   :  { %1238 = vmatmul.msk.f32.gmra.mxu1 %vm186_vm1, %v1315_v20 }
 0x257   :  { %1239 = vmatmul.msk.f32.gmra.mxu1 %vm186_vm1, %v1317_v23 }
 0x2a2   :  { %v329_v44 = vpop.permute.xlu1 %328 }
 0x2a3   :  { %v331_v45 = vmul.f32 %v329_v44, %v309_v36 }
 0x2a5   :  { %333 = vrot.lane.b32.xlu2 %v331_v45, %s1569_s3 }
 0x2ff   :  { %v334_v50 = vpop.permute.xlu2 %333 }
 0x300   :  { %v1743_v51 = vadd.f32 %v1303_v40, %v334_v50 }
 0x302   :  { %338 = vrot.lane.b32.xlu2 %v1743_v51, %s1568_s26 }
 0x35c   :  { %v339_v61 = vpop.permute.xlu2 %338 }
 0x35d   :  { %341 = vst.msk [vmem:[#allocation3] sm:$0xff] %vm186_vm1, %v339_v61  ;;  %1242 = vmatmul.msk.f32.vlgmr.msra.gmra.mxu3 %vm186_vm1, %v339_v61 }
 0x35e   :  { %644 = vmatpush.msra.mxu3 %v1653_v3 }
 0x360   :  { %645 = vmatpush.msra.mxu3 %v1658_v4 }
 0x362   :  { %646 = vmatpush.msra.mxu3 %v1665_v5 }
 0x364   :  { %v847_v0 = vld [vmem:[#allocation3] sm:$0xff]  ;;  %647 = vmatpush.msra.mxu3 %v1672_v6 }
 0x365   :  { %1256 = vmatmul.msk.f32.vlgmr.msrb.gmra.mxu0 %vm186_vm1, %v847_v0 }
 0x3e0   :  { %v361_v28 = vpop.f32.mrf.mxu3 }
 0x3e1   :  { %v362_v29 = vadd.f32 %v1710_v15, %v361_v28 }
 0x3e2   :  { %v901_v30 = vpop.f32.mrf.mxu0 }
 0x3e3   :  { %v902_v31 = vadd.f32 %v1800_v12, %v901_v30  ;;  %387 = vrot.lane.b32.xlu0 %v362_v29, %s1568_s26  ;;  %v366_v35 = vadd.f32 %v362_v29, %v232_v34 }
 0x3e5   :  { %1318 = vtanh.f32 %v902_v31  ;;  %v1243_v36 = vmul.f32 -1.442695, %v366_v35 }
 0x3e7   :  { %1320 = vpow2.f32 %v1243_v36 }
 0x3eb   :  { %v1319_v32 = vpop.eup %1318 }
 0x3ec   :  { %1264 = vmatmul.msk.f32.vlgmr.msrb.gmra.mxu1 %vm186_vm1, %v1319_v32 }
 0x3ed   :  { %v1321_v37 = vpop.eup %1320 }
 0x3ee   :  { %v370_v38 = vadd.f32 1.0, %v1321_v37 }
 0x3f0   :  { %1322 = vrcp.f32 %v370_v38  ;;  %v382_v44 = vand.u32 2147483648, %v370_v38  ;;  %vm376_vm7 = vweird.f32 %v370_v38  ;;  %v380_v45 = vand.u32 2147483647, %v370_v38 }
 0x3f2   :  { %v383_v47 = vor.u32 1.1754944e-38, %v382_v44  ;;  %vm381_vm9 = vcmp.eq.f32.partialorder %v380_v45, 8.507059e+37 }
 0x3f6   :  { %v1323_v39 = vpop.eup %1322 }
 0x3f7   :  { %v372_v40 = vmul.f32 %v1323_v39, %v370_v38  ;;  %vm377_vm6 = vweird.f32 %v1323_v39 }
 0x3f8   :  { %vm378_vm8 = vmor %vm376_vm7, %vm377_vm6 }
 0x3f9   :  { %v373_v41 = vsub.f32 1.0, %v372_v40 }
 0x3fb   :  { %v374_v42 = vmul.f32 %v1323_v39, %v373_v41 }
 0x3fd   :  { %v375_v43 = vadd.f32 %v1323_v39, %v374_v42 }
 0x3ff   :  { %v379_v46 = vsel %vm378_vm8, %v1323_v39, %v375_v43 }
 0x400   :  { %v384_v49 = vsel %vm381_vm9, %v383_v47, %v379_v46  ;;  %v237_v46 = vpop.f32.mrf.mxu1 }
 0x401   :  { %v238_v47 = vadd.f32 %v1715_v19, %v237_v46 }
 0x455   :  { %v388_v48 = vpop.permute.xlu0 %387 }
 0x456   :  { %v390_v50 = vmul.f32 %v388_v48, %v384_v49 }
 0x458   :  { %392 = vrot.lane.b32.xlu1 %v390_v50, %s1568_s26 }
 0x4ca   :  { %v393_v52 = vpop.permute.xlu1 %392 }
 0x4cb   :  { %v395_v53 = vadd.f32 %v393_v52, %v232_v34 }
 0x4cd   :  { %1324 = vtanh.f32 %v395_v53 }
 0x4d3   :  { %v1325_v54 = vpop.eup %1324 }
 0x4d4   :  { %v397_v55 = vsub.f32 %v1743_v51, %v1325_v54 }
 0x4d6   :  { %399 = vrot.lane.b32.xlu2 %v397_v55, %s1570_s0 }
 0x530   :  { %v400_v56 = vpop.permute.xlu2 %399 }
 0x531   :  { %v402_v61 = vmul.f32 %v400_v56, %v384_v49 }
 0x533   :  { %404 = vrot.lane.b32.xlu0 %v402_v61, %s1569_s3 }
 0x5a5   :  { %v405_v62 = vpop.permute.xlu0 %404 }
 0x5a6   :  { %v407_v63 = vadd.f32 %v1325_v54, %v405_v62 }
 0x5a8   :  { %409 = vrot.lane.b32.xlu1 %v407_v63, %s1568_s26 }
 0x61a   :  { %v410_v0 = vpop.permute.xlu1 %409 }
 0x61b   :  { %413 = vst.msk [vmem:[#allocation3 + $0x8] sm:$0xff] %vm186_vm1, %v410_v0  ;;  %1244 = vmatmul.msk.f32.vlgmr.msrb.gmra.mxu2 %vm186_vm1, %v410_v0 }
 0x61c   :  { %716 = vmatpush.msrb.mxu2 %v1653_v3 }
 0x61e   :  { %717 = vmatpush.msrb.mxu2 %v1658_v4 }
 0x620   :  { %718 = vmatpush.msrb.mxu2 %v1665_v5 }
 0x622   :  { %v848_v51 = vld [vmem:[#allocation3 + $0x8] sm:$0xff]  ;;  %719 = vmatpush.msrb.mxu2 %v1672_v6 }
 0x623   :  { %1257 = vmatmul.msk.f32.gmra.mxu0 %vm186_vm1, %v848_v51 }
 0x69e   :  { %v433_v1 = vpop.f32.mrf.mxu2 }
 0x69f   :  { %v434_v2 = vadd.f32 %v1710_v15, %v433_v1 }
 0x6a0   :  { %v904_v7 = vpop.f32.mrf.mxu0 }
 0x6a1   :  { %v905_v8 = vadd.f32 %v1800_v12, %v904_v7  ;;  %459 = vrot.lane.b32.xlu2 %v434_v2, %s1568_s26  ;;  %v438_v13 = vadd.f32 %v434_v2, %v235_v11 }
 0x6a3   :  { %1326 = vtanh.f32 %v905_v8  ;;  %v1245_v14 = vmul.f32 -1.442695, %v438_v13 }
 0x6a5   :  { %1328 = vpow2.f32 %v1245_v14 }
 0x6a9   :  { %v1327_v9 = vpop.eup %1326 }
 0x6aa   :  { %1265 = vmatmul.msk.f32.gmra.mxu1 %vm186_vm1, %v1327_v9 }
 0x6ab   :  { %v1329_v16 = vpop.eup %1328 }
 0x6ac   :  { %v442_v17 = vadd.f32 1.0, %v1329_v16 }
 0x6ae   :  { %1330 = vrcp.f32 %v442_v17  ;;  %v454_v28 = vand.u32 2147483648, %v442_v17  ;;  %vm448_vm11 = vweird.f32 %v442_v17  ;;  %v452_v29 = vand.u32 2147483647, %v442_v17 }
 0x6b0   :  { %v455_v31 = vor.u32 1.1754944e-38, %v454_v28  ;;  %vm453_vm13 = vcmp.eq.f32.partialorder %v452_v29, 8.507059e+37 }
 0x6b4   :  { %v1331_v18 = vpop.eup %1330 }
 0x6b5   :  { %v444_v20 = vmul.f32 %v1331_v18, %v442_v17  ;;  %vm449_vm10 = vweird.f32 %v1331_v18  ;;  %v240_v17 = vpop.f32.mrf.mxu1 }
 0x6b6   :  { %vm450_vm12 = vmor %vm448_vm11, %vm449_vm10 }
 0x6b7   :  { %v445_v21 = vsub.f32 1.0, %v444_v20 }
 0x6b9   :  { %v446_v22 = vmul.f32 %v1331_v18, %v445_v21 }
 0x6bb   :  { %v447_v23 = vadd.f32 %v1331_v18, %v446_v22 }
 0x6bd   :  { %v451_v30 = vsel %vm450_vm12, %v1331_v18, %v447_v23  ;;  %v241_v18 = vadd.f32 %v1715_v19, %v240_v17 }
 0x6be   :  { %v456_v33 = vsel %vm453_vm13, %v455_v31, %v451_v30 }
 0x6fb   :  { %v460_v32 = vpop.permute.xlu2 %459 }
 0x6fc   :  { %v462_v34 = vmul.f32 %v460_v32, %v456_v33 }
 0x6fe   :  { %464 = vrot.lane.b32.xlu0 %v462_v34, %s1568_s26 }
 0x770   :  { %v465_v35 = vpop.permute.xlu0 %464 }
 0x771   :  { %v467_v36 = vadd.f32 %v465_v35, %v235_v11 }
 0x773   :  { %1332 = vtanh.f32 %v467_v36 }
 0x779   :  { %v1333_v37 = vpop.eup %1332 }
 0x77a   :  { %v469_v38 = vsub.f32 %v407_v63, %v1333_v37 }
 0x77c   :  { %471 = vrot.lane.b32.xlu1 %v469_v38, %s1570_s0 }
 0x7ee   :  { %v472_v39 = vpop.permute.xlu1 %471 }
 0x7ef   :  { %v474_v40 = vmul.f32 %v472_v39, %v456_v33 }
 0x7f1   :  { %476 = vrot.lane.b32.xlu2 %v474_v40, %s1569_s3 }
 0x84b   :  { %v477_v41 = vpop.permute.xlu2 %476 }
 0x84c   :  { %v479_v42 = vadd.f32 %v1333_v37, %v477_v41 }
 0x84e   :  { %481 = vrot.lane.b32.xlu0 %v479_v42, %s1568_s26 }
 0x8c0   :  { %v482_v43 = vpop.permute.xlu0 %481 }
 0x8c1   :  { %485 = vst.msk [vmem:[#allocation3 + $0x10] sm:$0xff] %vm186_vm1, %v482_v43  ;;  %1246 = vmatmul.msk.f32.vlgmr.msrb.gmra.mxu3 %vm186_vm1, %v482_v43 }
 0x8c2   :  { %788 = vmatpush.msrb.mxu3 %v1653_v3 }
 0x8c4   :  { %789 = vmatpush.msrb.mxu3 %v1658_v4 }
 0x8c6   :  { %790 = vmatpush.msrb.mxu3 %v1665_v5 }
 0x8c8   :  { %791 = vmatpush.msrb.mxu3 %v1672_v6 }
 0x944   :  { %v505_v44 = vpop.f32.mrf.mxu3 }
 0x945   :  { %v506_v45 = vadd.f32 %v1710_v15, %v505_v44 }
 0x947   :  { %531 = vrot.lane.b32.xlu1 %v506_v45, %s1568_s26  ;;  %v510_v48 = vadd.f32 %v506_v45, %v238_v47 }
 0x949   :  { %v1247_v49 = vmul.f32 -1.442695, %v510_v48 }
 0x94b   :  { %1334 = vpow2.f32 %v1247_v49 }
 0x951   :  { %v1335_v50 = vpop.eup %1334 }
 0x952   :  { %v514_v52 = vadd.f32 1.0, %v1335_v50 }
 0x954   :  { %1336 = vrcp.f32 %v514_v52  ;;  %v526_v6 = vand.u32 2147483648, %v514_v52  ;;  %vm520_vm15 = vweird.f32 %v514_v52  ;;  %v524_v55 = vand.u32 2147483647, %v514_v52 }
 0x956   :  { %v527_v61 = vor.u32 1.1754944e-38, %v526_v6  ;;  %vm525_vm2 = vcmp.eq.f32.partialorder %v524_v55, 8.507059e+37 }
 0x95a   :  { %v1337_v3 = vpop.eup %1336 }
 0x95b   :  { %v516_v4 = vmul.f32 %v1337_v3, %v514_v52  ;;  %vm521_vm14 = vweird.f32 %v1337_v3 }
 0x95c   :  { %vm522_vm0 = vmor %vm520_vm15, %vm521_vm14 }
 0x95d   :  { %v517_v53 = vsub.f32 1.0, %v516_v4 }
 0x95f   :  { %v518_v5 = vmul.f32 %v1337_v3, %v517_v53 }
 0x961   :  { %v519_v54 = vadd.f32 %v1337_v3, %v518_v5 }
 0x963   :  { %v523_v56 = vsel %vm522_vm0, %v1337_v3, %v519_v54 }
 0x964   :  { %v528_v63 = vsel %vm525_vm2, %v527_v61, %v523_v56 }
 0x9b9   :  { %v532_v62 = vpop.permute.xlu1 %531 }
 0x9ba   :  { %v534_v0 = vmul.f32 %v532_v62, %v528_v63 }
 0x9bc   :  { %536 = vrot.lane.b32.xlu2 %v534_v0, %s1568_s26 }
 0xa16   :  { %v537_v51 = vpop.permute.xlu2 %536 }
 0xa17   :  { %v539_v1 = vadd.f32 %v537_v51, %v238_v47  ;;  %v243_v47 = vpop.f32.mrf.mxu1 }
 0xa18   :  { %v244_v48 = vadd.f32 %v1715_v19, %v243_v47 }
 0xa19   :  { %1338 = vtanh.f32 %v539_v1 }
 0xa1f   :  { %v1339_v2 = vpop.eup %1338 }
 0xa20   :  { %v541_v7 = vsub.f32 %v479_v42, %v1339_v2 }
 0xa22   :  { %543 = vrot.lane.b32.xlu0 %v541_v7, %s1570_s0 }
 0xa94   :  { %v544_v8 = vpop.permute.xlu0 %543 }
 0xa95   :  { %v546_v9 = vmul.f32 %v544_v8, %v528_v63 }
 0xa97   :  { %548 = vrot.lane.b32.xlu1 %v546_v9, %s1569_s3 }
 0xb09   :  { %v549_v10 = vpop.permute.xlu1 %548 }
 0xb0a   :  { %v551_v11 = vadd.f32 %v1339_v2, %v549_v10  ;;  %v849_v10 = vld [vmem:[#allocation3 + $0x10] sm:$0xff] }
 0xb0c   :  { %553 = vrot.lane.b32.xlu2 %v551_v11, %s1568_s26 }
 0xb66   :  { %v554_v13 = vpop.permute.xlu2 %553 }
 0xb67   :  { %557 = vst.msk [vmem:[#allocation3 + $0x18] sm:$0xff] %vm186_vm1, %v554_v13  ;;  %1248 = vmatmul.msk.f32.vlgmr.msra.gmra.mxu2 %vm186_vm1, %v554_v13 }
 0xb68   :  { %1272 = vmatpush.msra.mxu2 %v1757_v57 }
 0xb6a   :  { %1273 = vmatpush.msra.mxu2 %v1759_v58 }
 0xb6c   :  { %1274 = vmatpush.msra.mxu2 %v1762_v59 }
 0xb6e   :  { %1275 = vmatpush.msra.mxu2 %v1765_v60 }
 0xbea   :  { %v577_v14 = vpop.f32.mrf.mxu2 }
 0xbeb   :  { %v578_v16 = vadd.f32 %v1710_v15, %v577_v14 }
 0xbed   :  { %603 = vrot.lane.b32.xlu0 %v578_v16, %s1568_s26  ;;  %v582_v20 = vadd.f32 %v578_v16, %v241_v18 }
 0xbef   :  { %v1249_v21 = vmul.f32 -1.442695, %v582_v20 }
 0xbf1   :  { %1340 = vpow2.f32 %v1249_v21 }
 0xbf7   :  { %v1341_v22 = vpop.eup %1340 }
 0xbf8   :  { %v586_v23 = vadd.f32 1.0, %v1341_v22 }
 0xbfa   :  { %1342 = vrcp.f32 %v586_v23  ;;  %v598_v60 = vand.u32 2147483648, %v586_v23  ;;  %vm592_vm4 = vweird.f32 %v586_v23  ;;  %v596_v30 = vand.u32 2147483647, %v586_v23 }
 0xbfc   :  { %v599_v32 = vor.u32 1.1754944e-38, %v598_v60  ;;  %vm597_vm6 = vcmp.eq.f32.partialorder %v596_v30, 8.507059e+37 }
 0xc00   :  { %v1343_v57 = vpop.eup %1342 }
 0xc01   :  { %v588_v58 = vmul.f32 %v1343_v57, %v586_v23  ;;  %vm593_vm3 = vweird.f32 %v1343_v57 }
 0xc02   :  { %vm594_vm5 = vmor %vm592_vm4, %vm593_vm3 }
 0xc03   :  { %v589_v28 = vsub.f32 1.0, %v588_v58 }
 0xc05   :  { %v590_v59 = vmul.f32 %v1343_v57, %v589_v28 }
 0xc07   :  { %v591_v29 = vadd.f32 %v1343_v57, %v590_v59 }
 0xc09   :  { %v595_v31 = vsel %vm594_vm5, %v1343_v57, %v591_v29 }
 0xc0a   :  { %v600_v34 = vsel %vm597_vm6, %v599_v32, %v595_v31 }
 0xc5f   :  { %v604_v33 = vpop.permute.xlu0 %603 }
 0xc60   :  { %v606_v35 = vmul.f32 %v604_v33, %v600_v34 }
 0xc62   :  { %608 = vrot.lane.b32.xlu1 %v606_v35, %s1568_s26 }
 0xcd4   :  { %v609_v36 = vpop.permute.xlu1 %608 }
 0xcd5   :  { %v611_v37 = vadd.f32 %v609_v36, %v241_v18  ;;  %v246_v18 = vpop.f32.mrf.mxu1 }
 0xcd6   :  { %v247_v20 = vadd.f32 %v1715_v19, %v246_v18 }
 0xcd7   :  { %1344 = vtanh.f32 %v611_v37 }
 0xcdd   :  { %v1345_v38 = vpop.eup %1344 }
 0xcde   :  { %v613_v39 = vsub.f32 %v551_v11, %v1345_v38  ;;  %v850_v11 = vld [vmem:[#allocation3 + $0x18] sm:$0xff] }
 0xce0   :  { %615 = vrot.lane.b32.xlu2 %v613_v39, %s1570_s0 }
 0xd3a   :  { %v616_v40 = vpop.permute.xlu2 %615 }
 0xd3b   :  { %v618_v41 = vmul.f32 %v616_v40, %v600_v34 }
 0xd3d   :  { %620 = vrot.lane.b32.xlu0 %v618_v41, %s1569_s3 }
 0xdaf   :  { %v621_v42 = vpop.permute.xlu0 %620 }
 0xdb0   :  { %v623_v43 = vadd.f32 %v1345_v38, %v621_v42 }
 0xdb2   :  { %625 = vrot.lane.b32.xlu1 %v623_v43, %s1568_s26 }
 0xe24   :  { %v626_v44 = vpop.permute.xlu1 %625 }
 0xe25   :  { %629 = vst.msk [vmem:[#allocation3 + $0x20] sm:$0xff] %vm186_vm1, %v626_v44  ;;  %1250 = vmatmul.msk.f32.vlgmr.msra.gmra.mxu3 %vm186_vm1, %v626_v44 }
 0xe26   :  { %1276 = vmatpush.msra.mxu3 %v1788_v24 }
 0xe28   :  { %1277 = vmatpush.msra.mxu3 %v1791_v25 }
 0xe2a   :  { %1278 = vmatpush.msra.mxu3 %v1794_v26 }
 0xe2c   :  { %1279 = vmatpush.msra.mxu3 %v1797_v27  ;;  %v851_v13 = vld [vmem:[#allocation3 + $0x20] sm:$0xff] }
 0xea8   :  { %v649_v45 = vpop.f32.mrf.mxu3 }
 0xea9   :  { %v650_v46 = vadd.f32 %v1710_v15, %v649_v45 }
 0xeab   :  { %675 = vrot.lane.b32.xlu2 %v650_v46, %s1568_s26  ;;  %v654_v49 = vadd.f32 %v650_v46, %v244_v48 }
 0xead   :  { %v1251_v50 = vmul.f32 -1.442695, %v654_v49 }
 0xeaf   :  { %1346 = vpow2.f32 %v1251_v50 }
 0xeb5   :  { %v1347_v52 = vpop.eup %1346 }
 0xeb6   :  { %v658_v3 = vadd.f32 1.0, %v1347_v52 }
 0xeb8   :  { %1348 = vrcp.f32 %v658_v3  ;;  %v670_v27 = vand.u32 2147483648, %v658_v3  ;;  %vm664_vm8 = vweird.f32 %v658_v3  ;;  %v668_v5 = vand.u32 2147483647, %v658_v3 }
 0xeba   :  { %v671_v6 = vor.u32 1.1754944e-38, %v670_v27  ;;  %vm669_vm10 = vcmp.eq.f32.partialorder %v668_v5, 8.507059e+37 }
 0xebe   :  { %v1349_v24 = vpop.eup %1348 }
 0xebf   :  { %v660_v25 = vmul.f32 %v1349_v24, %v658_v3  ;;  %vm665_vm7 = vweird.f32 %v1349_v24 }
 0xec0   :  { %vm666_vm9 = vmor %vm664_vm8, %vm665_vm7 }
 0xec1   :  { %v661_v4 = vsub.f32 1.0, %v660_v25 }
 0xec3   :  { %v662_v26 = vmul.f32 %v1349_v24, %v661_v4 }
 0xec5   :  { %v663_v53 = vadd.f32 %v1349_v24, %v662_v26 }
 0xec7   :  { %v667_v54 = vsel %vm666_vm9, %v1349_v24, %v663_v53 }
 0xec8   :  { %v672_v56 = vsel %vm669_vm10, %v671_v6, %v667_v54 }
 0xf05   :  { %v676_v55 = vpop.permute.xlu2 %675 }
 0xf06   :  { %v678_v61 = vmul.f32 %v676_v55, %v672_v56 }
 0xf08   :  { %680 = vrot.lane.b32.xlu0 %v678_v61, %s1568_s26  ;;  %v249_v61 = vpop.f32.mrf.mxu1 }
 0xf7a   :  { %v681_v62 = vpop.permute.xlu0 %680 }
 0xf7b   :  { %v683_v63 = vadd.f32 %v681_v62, %v244_v48  ;;  %v250_v62 = vadd.f32 %v1715_v19, %v249_v61 }
 0xf7d   :  { %1350 = vtanh.f32 %v683_v63 }
 0xf83   :  { %v1351_v0 = vpop.eup %1350 }
 0xf84   :  { %v685_v51 = vsub.f32 %v623_v43, %v1351_v0 }
 0xf86   :  { %687 = vrot.lane.b32.xlu1 %v685_v51, %s1570_s0 }
 0xff8   :  { %v688_v1 = vpop.permute.xlu1 %687 }
 0xff9   :  { %v690_v2 = vmul.f32 %v688_v1, %v672_v56 }
 0xffb   :  { %692 = vrot.lane.b32.xlu2 %v690_v2, %s1569_s3 }
0x1055   :  { %v693_v7 = vpop.permute.xlu2 %692 }
0x1056   :  { %v695_v8 = vadd.f32 %v1351_v0, %v693_v7 }
0x1058   :  { %697 = vrot.lane.b32.xlu0 %v695_v8, %s1568_s26 }
0x10ca   :  { %v698_v9 = vpop.permute.xlu0 %697 }
0x10cb   :  { %701 = vst.msk [vmem:[#allocation3 + $0x28] sm:$0xff] %vm186_vm1, %v698_v9  ;;  %1252 = vmatmul.msk.f32.vlgmr.msrb.gmra.mxu2 %vm186_vm1, %v698_v9 }
0x10d2   :  { %v852_v14 = vld [vmem:[#allocation3 + $0x28] sm:$0xff] }
0x10d3   :  { %1258 = vmatmul.msk.f32.vlgmr.msra.gmra.mxu2 %vm186_vm1, %v849_v10 }
0x10db   :  { %1259 = vmatmul.msk.f32.gmra.mxu2 %vm186_vm1, %v850_v11 }
0x10e3   :  { %1260 = vmatmul.msk.f32.gmra.mxu2 %vm186_vm1, %v851_v13 }
0x10eb   :  { %1261 = vmatmul.msk.f32.gmra.mxu2 %vm186_vm1, %v852_v14 }
0x114e   :  { %v721_v16 = vpop.f32.mrf.mxu2 }
0x114f   :  { %v722_v17 = vadd.f32 %v1710_v15, %v721_v16 }
0x1151   :  { %747 = vrot.lane.b32.xlu1 %v722_v17, %s1568_s26  ;;  %v726_v21 = vadd.f32 %v722_v17, %v247_v20 }
0x1153   :  { %v1253_v22 = vmul.f32 -1.442695, %v726_v21 }
0x1155   :  { %1352 = vpow2.f32 %v1253_v22 }
0x1156   :  { %v907_v45 = vpop.f32.mrf.mxu2 }
0x1157   :  { %v908_v46 = vadd.f32 %v1800_v12, %v907_v45 }
0x115b   :  { %v1353_v23 = vpop.eup %1352 }
0x115c   :  { %v730_v57 = vadd.f32 1.0, %v1353_v23 }
0x115e   :  { %1354 = vrcp.f32 %v730_v57  ;;  %v742_v30 = vand.u32 2147483648, %v730_v57  ;;  %vm736_vm12 = vweird.f32 %v730_v57  ;;  %v740_v31 = vand.u32 2147483647, %v730_v57  ;;  %v910_v47 = vpop.f32.mrf.mxu2 }
0x115f   :  { %v911_v49 = vadd.f32 %v1800_v12, %v910_v47 }
0x1160   :  { %v743_v33 = vor.u32 1.1754944e-38, %v742_v30  ;;  %vm741_vm14 = vcmp.eq.f32.partialorder %v740_v31, 8.507059e+37 }
0x1164   :  { %v1355_v58 = vpop.eup %1354 }
0x1165   :  { %v732_v28 = vmul.f32 %v1355_v58, %v730_v57  ;;  %vm737_vm11 = vweird.f32 %v1355_v58  ;;  %v1902_v57 = vld [vmem:[#allocation10 + $0x4] ss:$0 sm:$0xff] }
0x1166   :  { %vm738_vm13 = vmor %vm736_vm12, %vm737_vm11  ;;  %v913_v3 = vpop.f32.mrf.mxu2 }
0x1167   :  { %v733_v59 = vsub.f32 1.0, %v732_v28  ;;  %v914_v24 = vadd.f32 %v1800_v12, %v913_v3 }
0x1169   :  { %v734_v29 = vmul.f32 %v1355_v58, %v733_v59 }
0x116b   :  { %v735_v60 = vadd.f32 %v1355_v58, %v734_v29 }
0x116d   :  { %v739_v32 = vsel %vm738_vm13, %v1355_v58, %v735_v60  ;;  %v979_v58 = vpop.f32.mrf.mxu1 }
0x116e   :  { %v744_v35 = vsel %vm741_vm14, %v743_v33, %v739_v32  ;;  %v916_v4 = vpop.f32.mrf.mxu2  ;;  %v980_v28 = vadd.f32 %v1902_v57, %v979_v58 }
0x116f   :  { %v917_v26 = vadd.f32 %v1800_v12, %v916_v4 }
0x1175   :  { %v982_v33 = vpop.f32.mrf.mxu1 }
0x11c3   :  { %v748_v34 = vpop.permute.xlu1 %747 }
0x11c4   :  { %v750_v36 = vmul.f32 %v748_v34, %v744_v35  ;;  %v983_v34 = vadd.f32 %v1902_v57, %v982_v33 }
0x11c6   :  { %752 = vrot.lane.b32.xlu2 %v750_v36, %s1568_s26 }
0x1220   :  { %v753_v37 = vpop.permute.xlu2 %752 }
0x1221   :  { %v755_v38 = vadd.f32 %v753_v37, %v247_v20 }
0x1223   :  { %1356 = vtanh.f32 %v755_v38 }
0x1224   :  { %1358 = vtanh.f32 %v908_v46 }
0x1225   :  { %1360 = vtanh.f32 %v911_v49 }
0x1226   :  { %1362 = vtanh.f32 %v914_v24 }
0x1227   :  { %1364 = vtanh.f32 %v917_v26 }
0x1229   :  { %v1357_v39 = vpop.eup %1356 }
0x122a   :  { %v757_v40 = vsub.f32 %v695_v8, %v1357_v39  ;;  %v1359_v50 = vpop.eup %1358 }
0x122b   :  { %v1361_v25 = vpop.eup %1360 }
0x122c   :  { %759 = vrot.lane.b32.xlu0 %v757_v40, %s1570_s0  ;;  %v1363_v53 = vpop.eup %1362 }
0x122d   :  { %v1365_v27 = vpop.eup %1364 }
0x129e   :  { %v760_v41 = vpop.permute.xlu0 %759 }
0x129f   :  { %v762_v42 = vmul.f32 %v760_v41, %v744_v35 }
0x12a1   :  { %764 = vrot.lane.b32.xlu1 %v762_v42, %s1569_s3 }
0x1313   :  { %v765_v43 = vpop.permute.xlu1 %764 }
0x1314   :  { %v1879_v44 = vadd.f32 %v1357_v39, %v765_v43 }
0x1316   :  { %769 = vrot.lane.b32.xlu2 %v1879_v44, %s1568_s26 }
0x1370   :  { %v770_v48 = vpop.permute.xlu2 %769 }
0x1371   :  { %773 = vst.msk [vmem:[#allocation3 + $0x30] sm:$0xff] %vm186_vm1, %v770_v48  ;;  %1254 = vmatmul.msk.f32.vlgmr.msrb.gmra.mxu3 %vm186_vm1, %v770_v48 }
0x1378   :  { %v853_v52 = vld [vmem:[#allocation3 + $0x30] sm:$0xff] }
0x1379   :  { %1262 = vmatmul.msk.f32.gmra.mxu2 %vm186_vm1, %v853_v52  ;;  %1266 = vmatmul.msk.f32.vlgmr.msra.gmra.mxu3 %vm186_vm1, %v1359_v50 }
0x1381   :  { %1267 = vmatmul.msk.f32.gmra.mxu3 %vm186_vm1, %v1361_v25 }
0x1389   :  { %1268 = vmatmul.msk.f32.gmra.mxu3 %vm186_vm1, %v1363_v53 }
0x1391   :  { %1269 = vmatmul.msk.f32.gmra.mxu3 %vm186_vm1, %v1365_v27 }
0x13f4   :  { %v793_v5 = vpop.f32.mrf.mxu3 }
0x13f5   :  { %v794_v54 = vadd.f32 %v1710_v15, %v793_v5 }
0x13f7   :  { %819 = vrot.lane.b32.xlu0 %v794_v54, %s1568_s26  ;;  %v798_v63 = vadd.f32 %v794_v54, %v250_v62 }
0x13f9   :  { %v1255_v0 = vmul.f32 -1.442695, %v798_v63 }
0x13fc   :  { %v919_v6 = vpop.f32.mrf.mxu2  ;;  %v985_v23 = vpop.f32.mrf.mxu3 }
0x13fd   :  { %v920_v55 = vadd.f32 %v1800_v12, %v919_v6  ;;  %v1915_v47 = vadd.f32 %v1902_v57, %v985_v23 }
0x13ff   :  { %1366 = vtanh.f32 %v920_v55 }
0x1400   :  { %1368 = vpow2.f32 %v1255_v0 }
0x1404   :  { %v988_v59 = vpop.f32.mrf.mxu3 }
0x1405   :  { %v1367_v56 = vpop.eup %1366  ;;  %v989_v29 = vadd.f32 %v1902_v57, %v988_v59 }
0x1406   :  { %1270 = vmatmul.msk.f32.gmra.mxu3 %vm186_vm1, %v1367_v56  ;;  %v1369_v51 = vpop.eup %1368 }
0x1407   :  { %v802_v1 = vadd.f32 1.0, %v1369_v51 }
0x1409   :  { %1370 = vrcp.f32 %v802_v1  ;;  %v814_v10 = vand.u32 2147483648, %v802_v1  ;;  %vm808_vm0 = vweird.f32 %v802_v1  ;;  %v812_v11 = vand.u32 2147483647, %v802_v1 }
0x140b   :  { %v815_v14 = vor.u32 1.1754944e-38, %v814_v10  ;;  %vm813_vm3 = vcmp.eq.f32.partialorder %v812_v11, 8.507059e+37 }
0x140c   :  { %v991_v60 = vpop.f32.mrf.mxu3 }
0x140d   :  { %v992_v30 = vadd.f32 %v1902_v57, %v991_v60 }
0x140f   :  { %v1371_v2 = vpop.eup %1370 }
0x1410   :  { %v804_v15 = vmul.f32 %v1371_v2, %v802_v1  ;;  %vm809_vm15 = vweird.f32 %v1371_v2 }
0x1411   :  { %vm810_vm2 = vmor %vm808_vm0, %vm809_vm15 }
0x1412   :  { %v805_v7 = vsub.f32 1.0, %v804_v15 }
0x1414   :  { %v806_v8 = vmul.f32 %v1371_v2, %v805_v7  ;;  %v994_v35 = vpop.f32.mrf.mxu3 }
0x1415   :  { %v1910_v36 = vadd.f32 %v1902_v57, %v994_v35 }
0x1416   :  { %v807_v9 = vadd.f32 %v1371_v2, %v806_v8 }
0x1418   :  { %v811_v13 = vsel %vm810_vm2, %v1371_v2, %v807_v9 }
0x1419   :  { %v816_v16 = vsel %vm813_vm3, %v815_v14, %v811_v13 }
0x1469   :  { %v820_v19 = vpop.permute.xlu0 %819 }
0x146a   :  { %v822_v17 = vmul.f32 %v820_v19, %v816_v16 }
0x146c   :  { %824 = vrot.lane.b32.xlu1 %v822_v17, %s1568_s26 }
0x1489   :  { %v997_v50 = vpop.f32.mrf.mxu3 }
0x148a   :  { %v998_v3 = vadd.f32 %v1902_v57, %v997_v50 }
0x14de   :  { %v825_v18 = vpop.permute.xlu1 %824 }
0x14df   :  { %v827_v20 = vadd.f32 %v825_v18, %v250_v62 }
0x14e1   :  { %1372 = vtanh.f32 %v827_v20 }
0x14e7   :  { %v1373_v21 = vpop.eup %1372 }
0x14e8   :  { %v829_v22 = vsub.f32 %v1879_v44, %v1373_v21 }
0x14ea   :  { %831 = vrot.lane.b32.xlu2 %v829_v22, %s1570_s0 }
0x1513   :  { %1003 = vmax.xlane.f32.xlu2 %v980_v28 }
0x151b   :  { %1009 = vmax.xlane.f32.xlu2 %v989_v29 }
0x1523   :  { %1011 = vmax.xlane.f32.xlu2 %v992_v30 }
0x1544   :  { %v832_v31 = vpop.permute.xlu2 %831 }
0x1545   :  { %v834_v32 = vmul.f32 %v832_v31, %v816_v16 }
0x1547   :  { %836 = vrot.lane.b32.xlu0 %v834_v32, %s1569_s3 }
0x1571   :  { %1005 = vmax.xlane.f32.xlu0 %v983_v34 }
0x1579   :  { %1013 = vmax.xlane.f32.xlu0 %v1910_v36 }
0x1586   :  { %v1004_v37 = vpop.xlane.xlu2 %1003 }
0x1587   :  { %v1019_v38 = vsub.f32 %v980_v28, %v1004_v37 }
0x1589   :  { %v1027_v39 = vmul.f32 1.442695, %v1019_v38 }
0x158b   :  { %1374 = vpow2.f32 %v1027_v39 }
0x158e   :  { %v1010_v40 = vpop.xlane.xlu2 %1009 }
0x158f   :  { %v1022_v41 = vsub.f32 %v989_v29, %v1010_v40 }
0x1591   :  { %v1375_v42 = vpop.eup %1374  ;;  %v1033_v43 = vmul.f32 1.442695, %v1022_v41 }
0x1592   :  { %1043 = vadd.xlane.f32.xlu0 %v1375_v42 }
0x1593   :  { %1376 = vpow2.f32 %v1033_v43 }
0x1596   :  { %v1012_v24 = vpop.xlane.xlu2 %1011 }
0x1597   :  { %v1023_v25 = vsub.f32 %v992_v30, %v1012_v24 }
0x1599   :  { %v1377_v44 = vpop.eup %1376  ;;  %v1035_v4 = vmul.f32 1.442695, %v1023_v25 }
0x159a   :  { %1049 = vadd.xlane.f32.xlu0 %v1377_v44 }
0x15b9   :  { %v837_v45 = vpop.permute.xlu0 %836 }
0x15ba   :  { %v839_v46 = vadd.f32 %v1373_v21, %v837_v45 }
0x15bc   :  { %841 = vrot.lane.b32.xlu1 %v839_v46, %s1568_s26 }
0x15e4   :  { %v1006_v48 = vpop.xlane.xlu0 %1005 }
0x15e5   :  { %v1020_v49 = vsub.f32 %v983_v34, %v1006_v48 }
0x15e6   :  { %1007 = vmax.xlane.f32.xlu1 %v1915_v47 }
0x15e7   :  { %v1029_v52 = vmul.f32 1.442695, %v1020_v49 }
0x15e9   :  { %1378 = vpow2.f32 %v1029_v52 }
0x15ea   :  { %1380 = vpow2.f32 %v1035_v4 }
0x15ec   :  { %v1924_v27 = vpop.xlane.xlu0 %1013 }
0x15ee   :  { %1015 = vmax.xlane.f32.xlu1 %v998_v3 }
0x15ef   :  { %v1919_v26 = vpop.eup %1378 }
0x15f0   :  { %v1922_v53 = vpop.eup %1380 }
0x15f6   :  { %1045 = vadd.xlane.f32.xlu1 %v1919_v26 }
0x15fe   :  { %1051 = vadd.xlane.f32.xlu1 %v1922_v53 }
0x1605   :  { %v1044_v5 = vpop.xlane.xlu0 %1043 }
0x1606   :  { %1382 = vrcp.f32 %v1044_v5  ;;  %v1070_v61 = vand.u32 2147483648, %v1044_v5  ;;  %v1068_v63 = vand.u32 2147483647, %v1044_v5  ;;  %vm1064_vm5 = vweird.f32 %v1044_v5 }
0x1608   :  { %v1071_v1 = vor.u32 1.1754944e-38, %v1070_v61  ;;  %vm1069_vm7 = vcmp.eq.f32.partialorder %v1068_v63, 8.507059e+37 }
0x160c   :  { %v1383_v54 = vpop.eup %1382 }
0x160d   :  { %v1060_v6 = vmul.f32 %v1383_v54, %v1044_v5  ;;  %v1050_v55 = vpop.xlane.xlu0 %1049  ;;  %vm1065_vm4 = vweird.f32 %v1383_v54 }
0x160e   :  { %1384 = vrcp.f32 %v1050_v55  ;;  %vm1066_vm6 = vmor %vm1064_vm5, %vm1065_vm4  ;;  %v1115_v10 = vand.u32 2147483648, %v1050_v55  ;;  %v1113_v13 = vand.u32 2147483647, %v1050_v55  ;;  %vm1109_vm9 = vweird.f32 %v1050_v55 }
0x160f   :  { %v1061_v56 = vsub.f32 1.0, %v1060_v6 }
0x1610   :  { %v1116_v19 = vor.u32 1.1754944e-38, %v1115_v10  ;;  %vm1114_vm11 = vcmp.eq.f32.partialorder %v1113_v13, 8.507059e+37 }
0x1611   :  { %v1062_v62 = vmul.f32 %v1383_v54, %v1061_v56 }
0x1613   :  { %v1063_v0 = vadd.f32 %v1383_v54, %v1062_v62 }
0x1614   :  { %v1385_v51 = vpop.eup %1384 }
0x1615   :  { %v1067_v2 = vsel %vm1066_vm6, %v1383_v54, %v1063_v0  ;;  %v1105_v15 = vmul.f32 %v1385_v51, %v1050_v55  ;;  %vm1110_vm8 = vweird.f32 %v1385_v51 }
0x1616   :  { %v1072_v7 = vsel %vm1069_vm7, %v1071_v1, %v1067_v2  ;;  %vm1111_vm10 = vmor %vm1109_vm9, %vm1110_vm8 }
0x1617   :  { %v1073_v8 = vmul.f32 %v1375_v42, %v1072_v7  ;;  %v1106_v9 = vsub.f32 1.0, %v1105_v15 }
0x1619   :  { %1179 = vst [vmem:[#allocation12] sm:$0xff] %v1073_v8  ;;  %v1107_v11 = vmul.f32 %v1385_v51, %v1106_v9  ;;  %v1024_v8 = vsub.f32 %v1910_v36, %v1924_v27 }
0x161b   :  { %v1108_v14 = vadd.f32 %v1385_v51, %v1107_v11  ;;  %v1037_v9 = vmul.f32 1.442695, %v1024_v8 }
0x161d   :  { %v1112_v16 = vsel %vm1111_vm10, %v1385_v51, %v1108_v14 }
0x161e   :  { %v1117_v17 = vsel %vm1114_vm11, %v1116_v19, %v1112_v16 }
0x161f   :  { %v1118_v18 = vmul.f32 %v1377_v44, %v1117_v17 }
0x1621   :  { %1182 = vst [vmem:[#allocation12 + $0x18] sm:$0xff] %v1118_v18 }
0x162e   :  { %v842_v20 = vpop.permute.xlu1 %841 }
0x162f   :  { %845 = vst.msk [vmem:[#allocation3 + $0x38] sm:$0xff] %vm186_vm1, %v842_v20 }
0x1630   :  { %846 = vst.msk [vmem:[#allocation13] sm:$0xff] %vm186_vm1, %v842_v20 }
0x1631   :  { %1210 = dma.vmem_to_hbm [thread:$0]  %s1206_s20, 128, %s1208_s5, [#allocation14]  }
0x1636   :  { %v854_v21 = vld [vmem:[#allocation3 + $0x38] sm:$0xff] }
0x1637   :  { %1263 = vmatmul.msk.f32.gmra.mxu2 %vm186_vm1, %v854_v21 }
0x1659   :  { %v1930_v22 = vpop.xlane.xlu1 %1007 }
0x165a   :  { %v1021_v1 = vsub.f32 %v1915_v47, %v1930_v22 }
0x165c   :  { %v1031_v2 = vmul.f32 1.442695, %v1021_v1 }
0x1661   :  { %v1016_v23 = vpop.xlane.xlu1 %1015 }
0x1662   :  { %v1025_v58 = vsub.f32 %v998_v3, %v1016_v23 }
0x1664   :  { %v1039_v28 = vmul.f32 1.442695, %v1025_v58 }
0x1666   :  { %1386 = vpow2.f32 %v1039_v28 }
0x1669   :  { %v1046_v59 = vpop.xlane.xlu1 %1045 }
0x166a   :  { %1388 = vrcp.f32 %v1046_v59  ;;  %v1085_v33 = vand.u32 2147483648, %v1046_v59  ;;  %v1083_v35 = vand.u32 2147483647, %v1046_v59  ;;  %vm1079_vm13 = vweird.f32 %v1046_v59 }
0x166c   :  { %v1387_v29 = vpop.eup %1386  ;;  %v1086_v39 = vor.u32 1.1754944e-38, %v1085_v33  ;;  %vm1084_vm15 = vcmp.eq.f32.partialorder %v1083_v35, 8.507059e+37 }
0x166d   :  { %1055 = vadd.xlane.f32.xlu0 %v1387_v29 }
0x1670   :  { %v1389_v60 = vpop.eup %1388 }
0x1671   :  { %v1075_v30 = vmul.f32 %v1389_v60, %v1046_v59  ;;  %v1052_v31 = vpop.xlane.xlu1 %1051  ;;  %vm1080_vm12 = vweird.f32 %v1389_v60 }
0x1672   :  { %1390 = vrcp.f32 %v1052_v31  ;;  %vm1081_vm14 = vmor %vm1079_vm13, %vm1080_vm12  ;;  %v1130_v45 = vand.u32 2147483648, %v1052_v31  ;;  %v1128_v48 = vand.u32 2147483647, %v1052_v31  ;;  %vm1124_vm2 = vweird.f32 %v1052_v31 }
0x1673   :  { %v1076_v32 = vsub.f32 1.0, %v1075_v30 }
0x1674   :  { %v1131_v50 = vor.u32 1.1754944e-38, %v1130_v45  ;;  %vm1129_vm4 = vcmp.eq.f32.partialorder %v1128_v48, 8.507059e+37 }
0x1675   :  { %v1077_v34 = vmul.f32 %v1389_v60, %v1076_v32 }
0x1677   :  { %v1078_v37 = vadd.f32 %v1389_v60, %v1077_v34 }
0x1678   :  { %v1391_v38 = vpop.eup %1390 }
0x1679   :  { %v1082_v40 = vsel %vm1081_vm14, %v1389_v60, %v1078_v37  ;;  %v1120_v41 = vmul.f32 %v1391_v38, %v1052_v31  ;;  %vm1125_vm0 = vweird.f32 %v1391_v38 }
0x167a   :  { %v1087_v42 = vsel %vm1084_vm15, %v1086_v39, %v1082_v40  ;;  %vm1126_vm3 = vmor %vm1124_vm2, %vm1125_vm0 }
0x167b   :  { %v1088_v43 = vmul.f32 %v1919_v26, %v1087_v42  ;;  %v1121_v44 = vsub.f32 1.0, %v1120_v41 }
0x167d   :  { %1180 = vst [vmem:[#allocation12 + $0x8] sm:$0xff] %v1088_v43  ;;  %v1122_v46 = vmul.f32 %v1391_v38, %v1121_v44 }
0x167f   :  { %v1123_v49 = vadd.f32 %v1391_v38, %v1122_v46 }
0x1681   :  { %v1127_v52 = vsel %vm1126_vm3, %v1391_v38, %v1123_v49 }
0x1682   :  { %v1132_v3 = vsel %vm1129_vm4, %v1131_v50, %v1127_v52 }
0x1683   :  { %v1133_v24 = vmul.f32 %v1922_v53, %v1132_v3 }
0x1685   :  { %1183 = vst [vmem:[#allocation12 + $0x20] sm:$0xff] %v1133_v24 }
0x16ba   :  { %v922_v25 = vpop.f32.mrf.mxu2 }
0x16bb   :  { %v923_v4 = vadd.f32 %v1800_v12, %v922_v25 }
0x16bd   :  { %1392 = vtanh.f32 %v923_v4 }
0x16c3   :  { %v1393_v26 = vpop.eup %1392 }
0x16c4   :  { %1271 = vmatmul.msk.f32.gmra.mxu3 %vm186_vm1, %v1393_v26 }
0x16e0   :  { %v1056_v5 = vpop.xlane.xlu0 %1055 }
0x16e1   :  { %1394 = vrcp.f32 %v1056_v5  ;;  %v1160_v56 = vand.u32 2147483648, %v1056_v5  ;;  %v1158_v62 = vand.u32 2147483647, %v1056_v5  ;;  %vm1154_vm6 = vweird.f32 %v1056_v5 }
0x16e2   :  { %1396 = vpow2.f32 %v1031_v2 }
0x16e3   :  { %v1161_v53 = vor.u32 1.1754944e-38, %v1160_v56  ;;  %vm1159_vm8 = vcmp.eq.f32.partialorder %v1158_v62, 8.507059e+37  ;;  %1398 = vpow2.f32 %v1037_v9 }
0x16e7   :  { %v1395_v54 = vpop.eup %1394 }
0x16e8   :  { %v1150_v6 = vmul.f32 %v1395_v54, %v1056_v5  ;;  %vm1155_vm5 = vweird.f32 %v1395_v54  ;;  %v1397_v10 = vpop.eup %1396 }
0x16e9   :  { %vm1156_vm7 = vmor %vm1154_vm6, %vm1155_vm5  ;;  %v1399_v11 = vpop.eup %1398 }
0x16ea   :  { %v1151_v55 = vsub.f32 1.0, %v1150_v6 }
0x16ec   :  { %v1152_v61 = vmul.f32 %v1395_v54, %v1151_v55 }
0x16ee   :  { %v1153_v63 = vadd.f32 %v1395_v54, %v1152_v61 }
0x16f0   :  { %v1157_v0 = vsel %vm1156_vm7, %v1395_v54, %v1153_v63 }
0x16f1   :  { %v1162_v12 = vsel %vm1159_vm8, %v1161_v53, %v1157_v0 }
0x16f2   :  { %v1163_v51 = vmul.f32 %v1387_v29, %v1162_v12 }
0x16f4   :  { %1185 = vst [vmem:[#allocation12 + $0x30] sm:$0xff] %v1163_v51 }
0x1747   :  { %v1000_v15 = vpop.f32.mrf.mxu3 }
0x1748   :  { %v1001_v7 = vadd.f32 %v1902_v57, %v1000_v15 }
0x174a   :  { %1017 = vmax.xlane.f32.xlu2 %v1001_v7 }
0x1752   :  { %1047 = vadd.xlane.f32.xlu2 %v1397_v10 }
0x175a   :  { %1053 = vadd.xlane.f32.xlu2 %v1399_v11 }
0x17bd   :  { %v1018_v13 = vpop.xlane.xlu2 %1017 }
0x17be   :  { %v1026_v14 = vsub.f32 %v1001_v7, %v1018_v13 }
0x17c0   :  { %v1041_v19 = vmul.f32 1.442695, %v1026_v14 }
0x17c2   :  { %1400 = vpow2.f32 %v1041_v19 }
0x17c5   :  { %v1048_v47 = vpop.xlane.xlu2 %1047 }
0x17c6   :  { %1402 = vrcp.f32 %v1048_v47  ;;  %v1100_v27 = vand.u32 2147483648, %v1048_v47  ;;  %v1098_v21 = vand.u32 2147483647, %v1048_v47  ;;  %vm1094_vm9 = vweird.f32 %v1048_v47 }
0x17c8   :  { %v1401_v16 = vpop.eup %1400  ;;  %v1101_v58 = vor.u32 1.1754944e-38, %v1100_v27  ;;  %vm1099_vm11 = vcmp.eq.f32.partialorder %v1098_v21, 8.507059e+37 }
0x17c9   :  { %1057 = vadd.xlane.f32.xlu1 %v1401_v16 }
0x17cc   :  { %v1403_v57 = vpop.eup %1402 }
0x17cd   :  { %v1090_v17 = vmul.f32 %v1403_v57, %v1048_v47  ;;  %v1054_v18 = vpop.xlane.xlu2 %1053  ;;  %vm1095_vm1 = vweird.f32 %v1403_v57 }
0x17ce   :  { %1404 = vrcp.f32 %v1054_v18  ;;  %vm1096_vm10 = vmor %vm1094_vm9, %vm1095_vm1  ;;  %v1145_v31 = vand.u32 2147483648, %v1054_v18  ;;  %v1143_v33 = vand.u32 2147483647, %v1054_v18  ;;  %vm1139_vm13 = vweird.f32 %v1054_v18 }
0x17cf   :  { %v1091_v36 = vsub.f32 1.0, %v1090_v17 }
0x17d0   :  { %v1146_v35 = vor.u32 1.1754944e-38, %v1145_v31  ;;  %vm1144_vm15 = vcmp.eq.f32.partialorder %v1143_v33, 8.507059e+37 }
0x17d1   :  { %v1092_v20 = vmul.f32 %v1403_v57, %v1091_v36 }
0x17d3   :  { %v1093_v22 = vadd.f32 %v1403_v57, %v1092_v20 }
0x17d4   :  { %v1405_v23 = vpop.eup %1404 }
0x17d5   :  { %v1097_v28 = vsel %vm1096_vm10, %v1403_v57, %v1093_v22  ;;  %v1135_v59 = vmul.f32 %v1405_v23, %v1054_v18  ;;  %vm1140_vm12 = vweird.f32 %v1405_v23 }
0x17d6   :  { %v1102_v29 = vsel %vm1099_vm11, %v1101_v58, %v1097_v28  ;;  %vm1141_vm14 = vmor %vm1139_vm13, %vm1140_vm12 }
0x17d7   :  { %v1103_v60 = vmul.f32 %v1397_v10, %v1102_v29  ;;  %v1136_v30 = vsub.f32 1.0, %v1135_v59 }
0x17d9   :  { %1181 = vst [vmem:[#allocation12 + $0x10] sm:$0xff] %v1103_v60  ;;  %v1137_v32 = vmul.f32 %v1405_v23, %v1136_v30 }
0x17db   :  { %v1138_v34 = vadd.f32 %v1405_v23, %v1137_v32 }
0x17dd   :  { %v1142_v37 = vsel %vm1141_vm14, %v1405_v23, %v1138_v34 }
0x17de   :  { %v1147_v38 = vsel %vm1144_vm15, %v1146_v35, %v1142_v37 }
0x17df   :  { %v1148_v39 = vmul.f32 %v1399_v11, %v1147_v38 }
0x17e1   :  { %1184 = vst [vmem:[#allocation12 + $0x28] sm:$0xff] %v1148_v39 }
0x183c   :  { %v1058_v40 = vpop.xlane.xlu1 %1057 }
0x183d   :  { %1406 = vrcp.f32 %v1058_v40  ;;  %v1175_v44 = vand.u32 2147483648, %v1058_v40  ;;  %v1173_v46 = vand.u32 2147483647, %v1058_v40  ;;  %vm1169_vm2 = vweird.f32 %v1058_v40 }
0x183f   :  { %v1176_v49 = vor.u32 1.1754944e-38, %v1175_v44  ;;  %vm1174_vm4 = vcmp.eq.f32.partialorder %v1173_v46, 8.507059e+37 }
0x1843   :  { %v1407_v41 = vpop.eup %1406 }
0x1844   :  { %v1165_v42 = vmul.f32 %v1407_v41, %v1058_v40  ;;  %vm1170_vm0 = vweird.f32 %v1407_v41 }
0x1845   :  { %vm1171_vm3 = vmor %vm1169_vm2, %vm1170_vm0 }
0x1846   :  { %v1166_v43 = vsub.f32 1.0, %v1165_v42 }
0x1848   :  { %v1167_v45 = vmul.f32 %v1407_v41, %v1166_v43 }
0x184a   :  { %v1168_v48 = vadd.f32 %v1407_v41, %v1167_v45 }
0x184c   :  { %v1172_v50 = vsel %vm1171_vm3, %v1407_v41, %v1168_v48 }
0x184d   :  { %v1177_v52 = vsel %vm1174_vm4, %v1176_v49, %v1172_v50 }
0x184e   :  { %v1178_v3 = vmul.f32 %v1401_v16, %v1177_v52 }
0x1850   :  { %1186 = vst [vmem:[#allocation12 + $0x38] sm:$0xff] %v1178_v3 }
0x1851   :  { %1199 = dma.vmem_to_hbm [thread:$0]  %s1192_s22, 1024, %s1194_s1, [#allocation6], %s1563_s17, %s1563_s17, %s1564_s18  }
0x1852   :  { %1558 = dma.done.wait [#allocation6], 1024  }
0x1853   :  { %1559 = vsyncadd [#allocation6], 4294966272 }
0x1854   :  { %1560 = dma.done.wait [#allocation14], 128  }
0x1855   :  { %1561 = vsyncadd [#allocation14], 4294967168 }
0x1856   :  { %1219 = vsyncpa [#allocation5], 1 }
0x1857   :  { %1220 = vsyncpa [#allocation8], 1 }
0x1858   :  { %1221 = vsyncpa [#allocation11], 1 }
0x1859   :  { %1222 = vsyncpa [#allocation6], 1 }
0x185a   :  { %1223 = vsyncpa [#allocation14], 1 }

</bundles_post_ra>
